<compile_context>
chip_gen: v7x
topology: tpu7x:2x2x1
jax: 0.10.0
libtpu: 0.0.40
codegen_flags: <defaults>
</compile_context>

<pallas_src>
import jax
import jax.numpy as jnp
from jax.experimental import pallas as pl
from jax.experimental.pallas import tpu as pltpu


def _choose_block_batch(N, L, max_lane_block=4096):
    """Largest per-step image count Nb (dividing N) whose lane block is aligned."""
    valid = [nb for nb in range(1, N + 1)
             if N % nb == 0 and ((nb * L) % 128 == 0 or nb == N)]
    fitting = [nb for nb in valid if nb * L <= max_lane_block]
    return max(fitting) if fitting else min(valid)


def _make_kernel(H, W, Cin, Cout, NbL, PAD, residual, has_proj):
    """Kernel over one lane block of Nb images (NbL = Nb*H*W lanes).

    x_ref  : (Cin, NbL)        bf16 activations, channels on sublanes, pixels on lanes
    rc_ref : (2, NbL)          int32 (h, w) coordinate of every lane
    w1_ref : (9, Cout, Cin)    conv1 taps (t = kh*3 + kw), bf16
    w2_ref : (9, Cout, Cout)   conv2 taps, bf16
    w3_ref : (Cout, Cin)       1x1 shortcut weight, bf16 (only if has_proj)
    b*_ref : (Cout, 1)         f32 biases
    out_ref: (Cout, NbL)       f32, lane-dense output slab
    buf_ref: (Cmax, NbL+2*PAD) bf16 scratch; activation sits at lane offset PAD.
             The PAD borders are never initialised: any tap lane that reads them
             is a conv-padding lane and is zeroed by the (row, col) mask below.
    """

    def kernel(x_ref, rc_ref, w1_ref, b1_ref, w2_ref, b2_ref, *rest):
        if has_proj:
            w3_ref, b3_ref, out_ref, buf_ref = rest
        else:
            out_ref, buf_ref = rest

        xv = x_ref[...]                      # (Cin, NbL) bf16
        row = rc_ref[0:1, :]                 # (1, NbL) int32: h per lane
        col = rc_ref[1:2, :]                 # (1, NbL) int32: w per lane

        def conv3x3(cin, w_ref):
            # Activation for this conv is resident in buf_ref[:cin, PAD:PAD+NbL].
            acc = jnp.zeros((Cout, NbL), jnp.float32)
            t = 0
            for dh in (-1, 0, 1):
                for dw in (-1, 0, 1):
                    s = dh * W + dw
                    tap = buf_ref[0:cin, PAD + s:PAD + s + NbL]   # static lane-offset read
                    conds = []
                    if dh == -1:
                        conds.append(row >= 1)
                    elif dh == 1:
                        conds.append(row < H - 1)
                    if dw == -1:
                        conds.append(col >= 1)
                    elif dw == 1:
                        conds.append(col < W - 1)
                    if conds:
                        m = conds[0]
                        for c in conds[1:]:
                            m = jnp.logical_and(m, c)
                        tap = jnp.where(m, tap, jnp.zeros_like(tap))
                    acc = acc + jnp.dot(w_ref[t], tap,
                                        preferred_element_type=jnp.float32)
                    t += 1
            return acc

        # ---- conv1: 3x3, stride 1, pad 1, then ReLU ----
        buf_ref[0:Cin, PAD:PAD + NbL] = xv
        y1 = jnp.maximum(conv3x3(Cin, w1_ref) + b1_ref[...], 0.0)

        # ---- conv2: 3x3, stride 1, pad 1 ----
        buf_ref[0:Cout, PAD:PAD + NbL] = y1.astype(jnp.bfloat16)
        y2 = conv3x3(Cout, w2_ref) + b2_ref[...]

        # ---- shortcut: 1x1 conv, or identity when Cin == Cout ----
        if residual != 'identity':
            if has_proj:
                sc = jnp.dot(w3_ref[...], xv,
                             preferred_element_type=jnp.float32) + b3_ref[...]
            else:
                sc = xv.astype(jnp.float32)

        if residual == 'add':
            out = sc + y2
        elif residual == 'minus':
            out = sc - y2
        elif residual == 'mul':
            out = sc * y2
        elif residual == 'identity':
            out = y2
        else:
            # TODO(synk): residual='concat' changes the output channel count; not implemented.
            raise NotImplementedError(residual)

        out_ref[...] = jnp.maximum(out, 0.0).astype(out_ref.dtype)

    return kernel


def residual_block(x_nchw, params, residual='add', stride=1, max_lane_block=4096):
    """Pallas TPU implementation of ResdiaulBlock.forward (NCHW in / NCHW out)."""
    assert stride == 1  # TODO(synk): strided conv1/conv3 not implemented (module default stride=1)
    if residual == 'concat':
        # TODO(synk): residual='concat' changes the output channel count; not implemented.
        raise NotImplementedError("residual='concat' not supported")
    if residual not in ('add', 'minus', 'mul', 'identity'):
        raise NotImplementedError(residual)

    w1, b1, w2, b2, w3, b3 = params
    N, Cin, H, W = x_nchw.shape
    Cout = w1.shape[0]
    L = H * W
    has_proj = w3 is not None

    Nb = _choose_block_batch(N, L, max_lane_block)   # images packed per grid step
    NbL = Nb * L
    PAD = ((W + 1 + 127) // 128) * 128               # halo >= W+1, lane-aligned
    Cmax = max(Cin, Cout)

    # Lane-dense channels-first activations: (Cin, N*H*W), bf16 for the MXU.
    x_cm = jnp.transpose(x_nchw, (1, 0, 2, 3)).reshape(Cin, N * L).astype(jnp.bfloat16)

    # (h, w) coordinates per lane for one block (pattern is periodic per image).
    row = jnp.repeat(jnp.arange(H, dtype=jnp.int32), W)
    col = jnp.tile(jnp.arange(W, dtype=jnp.int32), H)
    rc = jnp.tile(jnp.stack([row, col]), (1, Nb))    # (2, NbL)

    # 3x3 weights (PyTorch OIHW) as 9 (Cout, Cin) taps, tap index t = kh*3 + kw.
    w1_t = jnp.transpose(w1, (2, 3, 0, 1)).reshape(9, Cout, Cin).astype(jnp.bfloat16)
    w2_t = jnp.transpose(w2, (2, 3, 0, 1)).reshape(9, Cout, Cout).astype(jnp.bfloat16)
    b1_c = b1.reshape(Cout, 1).astype(jnp.float32)
    b2_c = b2.reshape(Cout, 1).astype(jnp.float32)

    in_specs = [
        pl.BlockSpec((Cin, NbL), lambda i: (0, i)),
        pl.BlockSpec((2, NbL), lambda i: (0, 0)),
        pl.BlockSpec((9, Cout, Cin), lambda i: (0, 0, 0)),
        pl.BlockSpec((Cout, 1), lambda i: (0, 0)),
        pl.BlockSpec((9, Cout, Cout), lambda i: (0, 0, 0)),
        pl.BlockSpec((Cout, 1), lambda i: (0, 0)),
    ]
    args = [x_cm, rc, w1_t, b1_c, w2_t, b2_c]
    if has_proj:
        w3_m = w3.reshape(Cout, Cin).astype(jnp.bfloat16)
        b3_c = b3.reshape(Cout, 1).astype(jnp.float32)
        in_specs += [pl.BlockSpec((Cout, Cin), lambda i: (0, 0)),
                     pl.BlockSpec((Cout, 1), lambda i: (0, 0))]
        args += [w3_m, b3_c]

    kernel = _make_kernel(H, W, Cin, Cout, NbL, PAD, residual, has_proj)

    out_cm = pl.pallas_call(
        kernel,
        out_shape=jax.ShapeDtypeStruct((Cout, N * L), jnp.float32),
        grid_spec=pltpu.PrefetchScalarGridSpec(
            num_scalar_prefetch=0,
            grid=(N // Nb,),
            in_specs=in_specs,
            out_specs=pl.BlockSpec((Cout, NbL), lambda i: (0, i)),
            scratch_shapes=[pltpu.VMEM((Cmax, NbL + 2 * PAD), jnp.bfloat16)],
        ),
        compiler_params=pltpu.CompilerParams(
            dimension_semantics=("parallel",),
            vmem_limit_bytes=32 * 1024 * 1024,
        ),
    )(*args)

    return jnp.transpose(out_cm.reshape(Cout, N, H, W), (1, 0, 2, 3))


def init_params(key, Cin, Cout):
    """xavier_uniform conv weights (PyTorch OIHW layout), zero biases."""
    k1, k2, k3 = jax.random.split(key, 3)

    def xavier(k, shape):
        o, i, kh, kw = shape
        fan_in, fan_out = i * kh * kw, o * kh * kw
        bound = (6.0 / (fan_in + fan_out)) ** 0.5
        return jax.random.uniform(k, shape, jnp.float32, -bound, bound)

    w1 = xavier(k1, (Cout, Cin, 3, 3)); b1 = jnp.zeros((Cout,), jnp.float32)
    w2 = xavier(k2, (Cout, Cout, 3, 3)); b2 = jnp.zeros((Cout,), jnp.float32)
    if Cin != Cout:
        w3 = xavier(k3, (Cout, Cin, 1, 1)); b3 = jnp.zeros((Cout,), jnp.float32)
    else:
        w3, b3 = None, None                           # conv3 = nn.Identity()
    return (w1, b1, w2, b2, w3, b3)


def reference(x_nchw, params, residual='add'):
    """Pure-JAX reference mirroring the module, with the same bf16 MXU inputs."""
    w1, b1, w2, b2, w3, b3 = params
    bf = lambda a: a.astype(jnp.bfloat16).astype(jnp.float32)
    dn = ('NCHW', 'OIHW', 'NCHW')
    x = bf(x_nchw)
    y = jax.lax.conv_general_dilated(x, bf(w1), (1, 1), 'SAME', dimension_numbers=dn)
    y = jnp.maximum(y + b1[None, :, None, None], 0.0)
    y = jax.lax.conv_general_dilated(bf(y), bf(w2), (1, 1), 'SAME', dimension_numbers=dn)
    y = y + b2[None, :, None, None]
    if w3 is not None:
        sc = jnp.einsum('oi,nihw->nohw', bf(w3[:, :, 0, 0]), x) + b3[None, :, None, None]
    else:
        sc = x
    if residual == 'add':
        out = sc + y
    elif residual == 'minus':
        out = sc - y
    elif residual == 'mul':
        out = sc * y
    elif residual == 'identity':
        out = y
    else:
        raise NotImplementedError(residual)
    return jnp.maximum(out, 0.0)


if __name__ == "__main__":
    key = jax.random.PRNGKey(0)
    kx, kp, kx2, kp2 = jax.random.split(key, 4)

    # Tolerance note: kernel and reference both use bf16 MXU inputs with f32
    # accumulation; tiny accumulation-order differences can flip an occasional
    # bf16 rounding of the conv1 output, so compare at 2e-2.
    ATOL = RTOL = 2e-2

    # Case 1: Cin != Cout -> exercises the 1x1 projection shortcut.
    N, Cin, Cout, H, W = 2, 4, 8, 16, 16
    x = jax.random.normal(kx, (N, Cin, H, W), jnp.float32)       # NCHW like PyTorch
    params = init_params(kp, Cin, Cout)
    out = jax.block_until_ready(residual_block(x, params, residual='add'))
    assert out.shape == (N, Cout, H, W), out.shape
    ref = reference(x, params, residual='add')
    if not bool(jnp.allclose(out, ref, atol=ATOL, rtol=RTOL)):
        err = float(jnp.max(jnp.abs(out - ref)))
        raise AssertionError(f"projection-shortcut case mismatch (max abs err {err:.3e})")

    # Case 2: Cin == Cout -> identity shortcut path (no conv3 weights at all).
    N2, C2 = 2, 8
    x2 = jax.random.normal(kx2, (N2, C2, H, W), jnp.float32)
    params2 = init_params(kp2, C2, C2)
    out2 = jax.block_until_ready(residual_block(x2, params2, residual='mul'))
    assert out2.shape == (N2, C2, H, W), out2.shape
    ref2 = reference(x2, params2, residual='mul')
    if not bool(jnp.allclose(out2, ref2, atol=ATOL, rtol=RTOL)):
        err = float(jnp.max(jnp.abs(out2 - ref2)))
        raise AssertionError(f"identity-shortcut case mismatch (max abs err {err:.3e})")

    print("KERNEL_OK")
</pallas_src>

<mosaic_0001>
module attributes {stable_mosaic.version = 11 : i64} {
  func.func @kernel(%arg0: i32, %arg1: memref<4x512xbf16, #tpu.memory_space<vmem>>, %arg2: memref<2x512xi32, #tpu.memory_space<vmem>>, %arg3: memref<9x8x4xbf16, #tpu.memory_space<vmem>>, %arg4: memref<8x1xf32, #tpu.memory_space<vmem>>, %arg5: memref<9x8x8xbf16, #tpu.memory_space<vmem>>, %arg6: memref<8x1xf32, #tpu.memory_space<vmem>>, %arg7: memref<8x4xbf16, #tpu.memory_space<vmem>>, %arg8: memref<8x1xf32, #tpu.memory_space<vmem>>, %arg9: memref<8x512xf32, #tpu.memory_space<vmem>>, %arg10: memref<8x768xbf16, #tpu.memory_space<vmem>>) attributes {dimension_semantics = [#tpu.dimension_semantics<parallel>], iteration_bounds = array<i64: 1>, scalar_prefetch = 0 : i64, scratch_operands = 1 : i64, tpu.core_type = #tpu.core_type<tc>, window_params = [{transform_indices = @transform_0, window_bounds = array<i64: 4, 512>}, {pipeline_mode = #tpu.pipeline_mode<synchronous>, transform_indices = @transform_1, window_bounds = array<i64: 2, 512>}, {pipeline_mode = #tpu.pipeline_mode<synchronous>, transform_indices = @transform_2, window_bounds = array<i64: 9, 8, 4>}, {pipeline_mode = #tpu.pipeline_mode<synchronous>, transform_indices = @transform_3, window_bounds = array<i64: 8, 1>}, {pipeline_mode = #tpu.pipeline_mode<synchronous>, transform_indices = @transform_4, window_bounds = array<i64: 9, 8, 8>}, {pipeline_mode = #tpu.pipeline_mode<synchronous>, transform_indices = @transform_5, window_bounds = array<i64: 8, 1>}, {pipeline_mode = #tpu.pipeline_mode<synchronous>, transform_indices = @transform_6, window_bounds = array<i64: 8, 4>}, {pipeline_mode = #tpu.pipeline_mode<synchronous>, transform_indices = @transform_7, window_bounds = array<i64: 8, 1>}, {transform_indices = @transform_8, window_bounds = array<i64: 8, 512>}]} {
    %c0 = arith.constant 0 : index
    %c0_0 = arith.constant 0 : index
    %0 = vector.load %arg1[%c0, %c0_0] : memref<4x512xbf16, #tpu.memory_space<vmem>>, vector<4x512xbf16>
    %c0_1 = arith.constant 0 : index
    %c0_2 = arith.constant 0 : index
    %1 = vector.load %arg2[%c0_1, %c0_2] : memref<2x512xi32, #tpu.memory_space<vmem>>, vector<1x512xi32>
    %c1 = arith.constant 1 : index
    %c0_3 = arith.constant 0 : index
    %2 = vector.load %arg2[%c1, %c0_3] : memref<2x512xi32, #tpu.memory_space<vmem>>, vector<1x512xi32>
    %c0_4 = arith.constant 0 : index
    %c128 = arith.constant 128 : index
    %3 = vector.load %arg10[%c0_4, %c128] : memref<8x768xbf16, #tpu.memory_space<vmem>>, vector<4x512xbf16>
    tpu.vector_store %arg10[%c0_4, %c128], %0 {strides = array<i32>} : memref<8x768xbf16, #tpu.memory_space<vmem>>, vector<4x512xbf16>,
    %cst = arith.constant 0.000000e+00 : f32
    %4 = vector.broadcast %cst : f32 to vector<8x512xf32>
    %c0_5 = arith.constant 0 : index
    %c111 = arith.constant 111 : index
    %5 = vector.load %arg10[%c0_5, %c111] : memref<8x768xbf16, #tpu.memory_space<vmem>>, vector<4x512xbf16>
    %c1_i32 = arith.constant 1 : i32
    %6 = vector.broadcast %c1_i32 : i32 to vector<1x512xi32>
    %7 = arith.cmpi sge, %1, %6 : vector<1x512xi32>
    %c1_i32_6 = arith.constant 1 : i32
    %8 = vector.broadcast %c1_i32_6 : i32 to vector<1x512xi32>
    %9 = arith.cmpi sge, %2, %8 : vector<1x512xi32>
    %10 = arith.andi %7, %9 : vector<1x512xi1>
    %cst_7 = arith.constant 0.000000e+00 : bf16
    %11 = vector.broadcast %cst_7 : bf16 to vector<4x512xbf16>
    %12 = vector.shape_cast %10 : vector<1x512xi1> to vector<1x512xi1>
    %13 = vector.broadcast %12 : vector<1x512xi1> to vector<4x512xi1>
    %14 = arith.select %13, %5, %11 : vector<4x512xi1>, vector<4x512xbf16>
    %c0_8 = arith.constant 0 : index
    %c0_9 = arith.constant 0 : index
    %c0_10 = arith.constant 0 : index
    %15 = vector.load %arg3[%c0_8, %c0_9, %c0_10] : memref<9x8x4xbf16, #tpu.memory_space<vmem>>, vector<1x8x4xbf16>
    %16 = vector.shape_cast %15 : vector<1x8x4xbf16> to vector<8x4xbf16>
    %cst_11 = arith.constant dense<0.000000e+00> : vector<8x512xf32>
    %17 = tpu.matmul %16, %14, %cst_11 {dimension_numbers = #tpu.dot_dimension_numbers<[1], [0], [0], [1], [0, 0, 1, 1], [], []>} : vector<8x4xbf16>, vector<4x512xbf16>, vector<8x512xf32> -> vector<8x512xf32>
    %18 = arith.addf %4, %17 : vector<8x512xf32>
    %c0_12 = arith.constant 0 : index
    %c112 = arith.constant 112 : index
    %19 = vector.load %arg10[%c0_12, %c112] : memref<8x768xbf16, #tpu.memory_space<vmem>>, vector<4x512xbf16>
    %c1_i32_13 = arith.constant 1 : i32
    %20 = vector.broadcast %c1_i32_13 : i32 to vector<1x512xi32>
    %21 = arith.cmpi sge, %1, %20 : vector<1x512xi32>
    %cst_14 = arith.constant 0.000000e+00 : bf16
    %22 = vector.broadcast %cst_14 : bf16 to vector<4x512xbf16>
    %23 = vector.shape_cast %21 : vector<1x512xi1> to vector<1x512xi1>
    %24 = vector.broadcast %23 : vector<1x512xi1> to vector<4x512xi1>
    %25 = arith.select %24, %19, %22 : vector<4x512xi1>, vector<4x512xbf16>
    %c1_15 = arith.constant 1 : index
    %c0_16 = arith.constant 0 : index
    %c0_17 = arith.constant 0 : index
    %26 = vector.load %arg3[%c1_15, %c0_16, %c0_17] : memref<9x8x4xbf16, #tpu.memory_space<vmem>>, vector<1x8x4xbf16>
    %27 = vector.shape_cast %26 : vector<1x8x4xbf16> to vector<8x4xbf16>
    %cst_18 = arith.constant dense<0.000000e+00> : vector<8x512xf32>
    %28 = tpu.matmul %27, %25, %cst_18 {dimension_numbers = #tpu.dot_dimension_numbers<[1], [0], [0], [1], [0, 0, 1, 1], [], []>} : vector<8x4xbf16>, vector<4x512xbf16>, vector<8x512xf32> -> vector<8x512xf32>
    %29 = arith.addf %18, %28 : vector<8x512xf32>
    %c0_19 = arith.constant 0 : index
    %c113 = arith.constant 113 : index
    %30 = vector.load %arg10[%c0_19, %c113] : memref<8x768xbf16, #tpu.memory_space<vmem>>, vector<4x512xbf16>
    %c1_i32_20 = arith.constant 1 : i32
    %31 = vector.broadcast %c1_i32_20 : i32 to vector<1x512xi32>
    %32 = arith.cmpi sge, %1, %31 : vector<1x512xi32>
    %c15_i32 = arith.constant 15 : i32
    %33 = vector.broadcast %c15_i32 : i32 to vector<1x512xi32>
    %34 = arith.cmpi slt, %2, %33 : vector<1x512xi32>
    %35 = arith.andi %32, %34 : vector<1x512xi1>
    %cst_21 = arith.constant 0.000000e+00 : bf16
    %36 = vector.broadcast %cst_21 : bf16 to vector<4x512xbf16>
    %37 = vector.shape_cast %35 : vector<1x512xi1> to vector<1x512xi1>
    %38 = vector.broadcast %37 : vector<1x512xi1> to vector<4x512xi1>
    %39 = arith.select %38, %30, %36 : vector<4x512xi1>, vector<4x512xbf16>
    %c2 = arith.constant 2 : index
    %c0_22 = arith.constant 0 : index
    %c0_23 = arith.constant 0 : index
    %40 = vector.load %arg3[%c2, %c0_22, %c0_23] : memref<9x8x4xbf16, #tpu.memory_space<vmem>>, vector<1x8x4xbf16>
    %41 = vector.shape_cast %40 : vector<1x8x4xbf16> to vector<8x4xbf16>
    %cst_24 = arith.constant dense<0.000000e+00> : vector<8x512xf32>
    %42 = tpu.matmul %41, %39, %cst_24 {dimension_numbers = #tpu.dot_dimension_numbers<[1], [0], [0], [1], [0, 0, 1, 1], [], []>} : vector<8x4xbf16>, vector<4x512xbf16>, vector<8x512xf32> -> vector<8x512xf32>
    %43 = arith.addf %29, %42 : vector<8x512xf32>
    %c0_25 = arith.constant 0 : index
    %c127 = arith.constant 127 : index
    %44 = vector.load %arg10[%c0_25, %c127] : memref<8x768xbf16, #tpu.memory_space<vmem>>, vector<4x512xbf16>
    %c1_i32_26 = arith.constant 1 : i32
    %45 = vector.broadcast %c1_i32_26 : i32 to vector<1x512xi32>
    %46 = arith.cmpi sge, %2, %45 : vector<1x512xi32>
    %cst_27 = arith.constant 0.000000e+00 : bf16
    %47 = vector.broadcast %cst_27 : bf16 to vector<4x512xbf16>
    %48 = vector.shape_cast %46 : vector<1x512xi1> to vector<1x512xi1>
    %49 = vector.broadcast %48 : vector<1x512xi1> to vector<4x512xi1>
    %50 = arith.select %49, %44, %47 : vector<4x512xi1>, vector<4x512xbf16>
    %c3 = arith.constant 3 : index
    %c0_28 = arith.constant 0 : index
    %c0_29 = arith.constant 0 : index
    %51 = vector.load %arg3[%c3, %c0_28, %c0_29] : memref<9x8x4xbf16, #tpu.memory_space<vmem>>, vector<1x8x4xbf16>
    %52 = vector.shape_cast %51 : vector<1x8x4xbf16> to vector<8x4xbf16>
    %cst_30 = arith.constant dense<0.000000e+00> : vector<8x512xf32>
    %53 = tpu.matmul %52, %50, %cst_30 {dimension_numbers = #tpu.dot_dimension_numbers<[1], [0], [0], [1], [0, 0, 1, 1], [], []>} : vector<8x4xbf16>, vector<4x512xbf16>, vector<8x512xf32> -> vector<8x512xf32>
    %54 = arith.addf %43, %53 : vector<8x512xf32>
    %c0_31 = arith.constant 0 : index
    %c128_32 = arith.constant 128 : index
    %55 = vector.load %arg10[%c0_31, %c128_32] : memref<8x768xbf16, #tpu.memory_space<vmem>>, vector<4x512xbf16>
    %c4 = arith.constant 4 : index
    %c0_33 = arith.constant 0 : index
    %c0_34 = arith.constant 0 : index
    %56 = vector.load %arg3[%c4, %c0_33, %c0_34] : memref<9x8x4xbf16, #tpu.memory_space<vmem>>, vector<1x8x4xbf16>
    %57 = vector.shape_cast %56 : vector<1x8x4xbf16> to vector<8x4xbf16>
    %cst_35 = arith.constant dense<0.000000e+00> : vector<8x512xf32>
    %58 = tpu.matmul %57, %55, %cst_35 {dimension_numbers = #tpu.dot_dimension_numbers<[1], [0], [0], [1], [0, 0, 1, 1], [], []>} : vector<8x4xbf16>, vector<4x512xbf16>, vector<8x512xf32> -> vector<8x512xf32>
    %59 = arith.addf %54, %58 : vector<8x512xf32>
    %c0_36 = arith.constant 0 : index
    %c129 = arith.constant 129 : index
    %60 = vector.load %arg10[%c0_36, %c129] : memref<8x768xbf16, #tpu.memory_space<vmem>>, vector<4x512xbf16>
    %c15_i32_37 = arith.constant 15 : i32
    %61 = vector.broadcast %c15_i32_37 : i32 to vector<1x512xi32>
    %62 = arith.cmpi slt, %2, %61 : vector<1x512xi32>
    %cst_38 = arith.constant 0.000000e+00 : bf16
    %63 = vector.broadcast %cst_38 : bf16 to vector<4x512xbf16>
    %64 = vector.shape_cast %62 : vector<1x512xi1> to vector<1x512xi1>
    %65 = vector.broadcast %64 : vector<1x512xi1> to vector<4x512xi1>
    %66 = arith.select %65, %60, %63 : vector<4x512xi1>, vector<4x512xbf16>
    %c5 = arith.constant 5 : index
    %c0_39 = arith.constant 0 : index
    %c0_40 = arith.constant 0 : index
    %67 = vector.load %arg3[%c5, %c0_39, %c0_40] : memref<9x8x4xbf16, #tpu.memory_space<vmem>>, vector<1x8x4xbf16>
    %68 = vector.shape_cast %67 : vector<1x8x4xbf16> to vector<8x4xbf16>
    %cst_41 = arith.constant dense<0.000000e+00> : vector<8x512xf32>
    %69 = tpu.matmul %68, %66, %cst_41 {dimension_numbers = #tpu.dot_dimension_numbers<[1], [0], [0], [1], [0, 0, 1, 1], [], []>} : vector<8x4xbf16>, vector<4x512xbf16>, vector<8x512xf32> -> vector<8x512xf32>
    %70 = arith.addf %59, %69 : vector<8x512xf32>
    %c0_42 = arith.constant 0 : index
    %c143 = arith.constant 143 : index
    %71 = vector.load %arg10[%c0_42, %c143] : memref<8x768xbf16, #tpu.memory_space<vmem>>, vector<4x512xbf16>
    %c15_i32_43 = arith.constant 15 : i32
    %72 = vector.broadcast %c15_i32_43 : i32 to vector<1x512xi32>
    %73 = arith.cmpi slt, %1, %72 : vector<1x512xi32>
    %c1_i32_44 = arith.constant 1 : i32
    %74 = vector.broadcast %c1_i32_44 : i32 to vector<1x512xi32>
    %75 = arith.cmpi sge, %2, %74 : vector<1x512xi32>
    %76 = arith.andi %73, %75 : vector<1x512xi1>
    %cst_45 = arith.constant 0.000000e+00 : bf16
    %77 = vector.broadcast %cst_45 : bf16 to vector<4x512xbf16>
    %78 = vector.shape_cast %76 : vector<1x512xi1> to vector<1x512xi1>
    %79 = vector.broadcast %78 : vector<1x512xi1> to vector<4x512xi1>
    %80 = arith.select %79, %71, %77 : vector<4x512xi1>, vector<4x512xbf16>
    %c6 = arith.constant 6 : index
    %c0_46 = arith.constant 0 : index
    %c0_47 = arith.constant 0 : index
    %81 = vector.load %arg3[%c6, %c0_46, %c0_47] : memref<9x8x4xbf16, #tpu.memory_space<vmem>>, vector<1x8x4xbf16>
    %82 = vector.shape_cast %81 : vector<1x8x4xbf16> to vector<8x4xbf16>
    %cst_48 = arith.constant dense<0.000000e+00> : vector<8x512xf32>
    %83 = tpu.matmul %82, %80, %cst_48 {dimension_numbers = #tpu.dot_dimension_numbers<[1], [0], [0], [1], [0, 0, 1, 1], [], []>} : vector<8x4xbf16>, vector<4x512xbf16>, vector<8x512xf32> -> vector<8x512xf32>
    %84 = arith.addf %70, %83 : vector<8x512xf32>
    %c0_49 = arith.constant 0 : index
    %c144 = arith.constant 144 : index
    %85 = vector.load %arg10[%c0_49, %c144] : memref<8x768xbf16, #tpu.memory_space<vmem>>, vector<4x512xbf16>
    %c15_i32_50 = arith.constant 15 : i32
    %86 = vector.broadcast %c15_i32_50 : i32 to vector<1x512xi32>
    %87 = arith.cmpi slt, %1, %86 : vector<1x512xi32>
    %cst_51 = arith.constant 0.000000e+00 : bf16
    %88 = vector.broadcast %cst_51 : bf16 to vector<4x512xbf16>
    %89 = vector.shape_cast %87 : vector<1x512xi1> to vector<1x512xi1>
    %90 = vector.broadcast %89 : vector<1x512xi1> to vector<4x512xi1>
    %91 = arith.select %90, %85, %88 : vector<4x512xi1>, vector<4x512xbf16>
    %c7 = arith.constant 7 : index
    %c0_52 = arith.constant 0 : index
    %c0_53 = arith.constant 0 : index
    %92 = vector.load %arg3[%c7, %c0_52, %c0_53] : memref<9x8x4xbf16, #tpu.memory_space<vmem>>, vector<1x8x4xbf16>
    %93 = vector.shape_cast %92 : vector<1x8x4xbf16> to vector<8x4xbf16>
    %cst_54 = arith.constant dense<0.000000e+00> : vector<8x512xf32>
    %94 = tpu.matmul %93, %91, %cst_54 {dimension_numbers = #tpu.dot_dimension_numbers<[1], [0], [0], [1], [0, 0, 1, 1], [], []>} : vector<8x4xbf16>, vector<4x512xbf16>, vector<8x512xf32> -> vector<8x512xf32>
    %95 = arith.addf %84, %94 : vector<8x512xf32>
    %c0_55 = arith.constant 0 : index
    %c145 = arith.constant 145 : index
    %96 = vector.load %arg10[%c0_55, %c145] : memref<8x768xbf16, #tpu.memory_space<vmem>>, vector<4x512xbf16>
    %c15_i32_56 = arith.constant 15 : i32
    %97 = vector.broadcast %c15_i32_56 : i32 to vector<1x512xi32>
    %98 = arith.cmpi slt, %1, %97 : vector<1x512xi32>
    %c15_i32_57 = arith.constant 15 : i32
    %99 = vector.broadcast %c15_i32_57 : i32 to vector<1x512xi32>
    %100 = arith.cmpi slt, %2, %99 : vector<1x512xi32>
    %101 = arith.andi %98, %100 : vector<1x512xi1>
    %cst_58 = arith.constant 0.000000e+00 : bf16
    %102 = vector.broadcast %cst_58 : bf16 to vector<4x512xbf16>
    %103 = vector.shape_cast %101 : vector<1x512xi1> to vector<1x512xi1>
    %104 = vector.broadcast %103 : vector<1x512xi1> to vector<4x512xi1>
    %105 = arith.select %104, %96, %102 : vector<4x512xi1>, vector<4x512xbf16>
    %c8 = arith.constant 8 : index
    %c0_59 = arith.constant 0 : index
    %c0_60 = arith.constant 0 : index
    %106 = vector.load %arg3[%c8, %c0_59, %c0_60] : memref<9x8x4xbf16, #tpu.memory_space<vmem>>, vector<1x8x4xbf16>
    %107 = vector.shape_cast %106 : vector<1x8x4xbf16> to vector<8x4xbf16>
    %cst_61 = arith.constant dense<0.000000e+00> : vector<8x512xf32>
    %108 = tpu.matmul %107, %105, %cst_61 {dimension_numbers = #tpu.dot_dimension_numbers<[1], [0], [0], [1], [0, 0, 1, 1], [], []>} : vector<8x4xbf16>, vector<4x512xbf16>, vector<8x512xf32> -> vector<8x512xf32>
    %109 = arith.addf %95, %108 : vector<8x512xf32>
    %c0_62 = arith.constant 0 : index
    %c0_63 = arith.constant 0 : index
    %110 = vector.load %arg4[%c0_62, %c0_63] : memref<8x1xf32, #tpu.memory_space<vmem>>, vector<8x1xf32>
    %111 = vector.broadcast %110 : vector<8x1xf32> to vector<8x512xf32>
    %112 = arith.addf %109, %111 : vector<8x512xf32>
    %cst_64 = arith.constant 0.000000e+00 : f32
    %113 = vector.broadcast %cst_64 : f32 to vector<8x512xf32>
    %114 = arith.maximumf %112, %113 : vector<8x512xf32>
    %115 = arith.truncf %114 : vector<8x512xf32> to vector<8x512xbf16>
    %c0_65 = arith.constant 0 : index
    %c128_66 = arith.constant 128 : index
    %116 = vector.load %arg10[%c0_65, %c128_66] : memref<8x768xbf16, #tpu.memory_space<vmem>>, vector<8x512xbf16>
    tpu.vector_store %arg10[%c0_65, %c128_66], %115 {strides = array<i32>} : memref<8x768xbf16, #tpu.memory_space<vmem>>, vector<8x512xbf16>,
    %cst_67 = arith.constant 0.000000e+00 : f32
    %117 = vector.broadcast %cst_67 : f32 to vector<8x512xf32>
    %c0_68 = arith.constant 0 : index
    %c111_69 = arith.constant 111 : index
    %118 = vector.load %arg10[%c0_68, %c111_69] : memref<8x768xbf16, #tpu.memory_space<vmem>>, vector<8x512xbf16>
    %c1_i32_70 = arith.constant 1 : i32
    %119 = vector.broadcast %c1_i32_70 : i32 to vector<1x512xi32>
    %120 = arith.cmpi sge, %1, %119 : vector<1x512xi32>
    %c1_i32_71 = arith.constant 1 : i32
    %121 = vector.broadcast %c1_i32_71 : i32 to vector<1x512xi32>
    %122 = arith.cmpi sge, %2, %121 : vector<1x512xi32>
    %123 = arith.andi %120, %122 : vector<1x512xi1>
    %cst_72 = arith.constant 0.000000e+00 : bf16
    %124 = vector.broadcast %cst_72 : bf16 to vector<8x512xbf16>
    %125 = vector.shape_cast %123 : vector<1x512xi1> to vector<1x512xi1>
    %126 = vector.broadcast %125 : vector<1x512xi1> to vector<8x512xi1>
    %127 = arith.select %126, %118, %124 : vector<8x512xi1>, vector<8x512xbf16>
    %c0_73 = arith.constant 0 : index
    %c0_74 = arith.constant 0 : index
    %c0_75 = arith.constant 0 : index
    %128 = vector.load %arg5[%c0_73, %c0_74, %c0_75] : memref<9x8x8xbf16, #tpu.memory_space<vmem>>, vector<1x8x8xbf16>
    %129 = vector.shape_cast %128 : vector<1x8x8xbf16> to vector<8x8xbf16>
    %cst_76 = arith.constant dense<0.000000e+00> : vector<8x512xf32>
    %130 = tpu.matmul %129, %127, %cst_76 {dimension_numbers = #tpu.dot_dimension_numbers<[1], [0], [0], [1], [0, 0, 1, 1], [], []>} : vector<8x8xbf16>, vector<8x512xbf16>, vector<8x512xf32> -> vector<8x512xf32>
    %131 = arith.addf %117, %130 : vector<8x512xf32>
    %c0_77 = arith.constant 0 : index
    %c112_78 = arith.constant 112 : index
    %132 = vector.load %arg10[%c0_77, %c112_78] : memref<8x768xbf16, #tpu.memory_space<vmem>>, vector<8x512xbf16>
    %c1_i32_79 = arith.constant 1 : i32
    %133 = vector.broadcast %c1_i32_79 : i32 to vector<1x512xi32>
    %134 = arith.cmpi sge, %1, %133 : vector<1x512xi32>
    %cst_80 = arith.constant 0.000000e+00 : bf16
    %135 = vector.broadcast %cst_80 : bf16 to vector<8x512xbf16>
    %136 = vector.shape_cast %134 : vector<1x512xi1> to vector<1x512xi1>
    %137 = vector.broadcast %136 : vector<1x512xi1> to vector<8x512xi1>
    %138 = arith.select %137, %132, %135 : vector<8x512xi1>, vector<8x512xbf16>
    %c1_81 = arith.constant 1 : index
    %c0_82 = arith.constant 0 : index
    %c0_83 = arith.constant 0 : index
    %139 = vector.load %arg5[%c1_81, %c0_82, %c0_83] : memref<9x8x8xbf16, #tpu.memory_space<vmem>>, vector<1x8x8xbf16>
    %140 = vector.shape_cast %139 : vector<1x8x8xbf16> to vector<8x8xbf16>
    %cst_84 = arith.constant dense<0.000000e+00> : vector<8x512xf32>
    %141 = tpu.matmul %140, %138, %cst_84 {dimension_numbers = #tpu.dot_dimension_numbers<[1], [0], [0], [1], [0, 0, 1, 1], [], []>} : vector<8x8xbf16>, vector<8x512xbf16>, vector<8x512xf32> -> vector<8x512xf32>
    %142 = arith.addf %131, %141 : vector<8x512xf32>
    %c0_85 = arith.constant 0 : index
    %c113_86 = arith.constant 113 : index
    %143 = vector.load %arg10[%c0_85, %c113_86] : memref<8x768xbf16, #tpu.memory_space<vmem>>, vector<8x512xbf16>
    %c1_i32_87 = arith.constant 1 : i32
    %144 = vector.broadcast %c1_i32_87 : i32 to vector<1x512xi32>
    %145 = arith.cmpi sge, %1, %144 : vector<1x512xi32>
    %c15_i32_88 = arith.constant 15 : i32
    %146 = vector.broadcast %c15_i32_88 : i32 to vector<1x512xi32>
    %147 = arith.cmpi slt, %2, %146 : vector<1x512xi32>
    %148 = arith.andi %145, %147 : vector<1x512xi1>
    %cst_89 = arith.constant 0.000000e+00 : bf16
    %149 = vector.broadcast %cst_89 : bf16 to vector<8x512xbf16>
    %150 = vector.shape_cast %148 : vector<1x512xi1> to vector<1x512xi1>
    %151 = vector.broadcast %150 : vector<1x512xi1> to vector<8x512xi1>
    %152 = arith.select %151, %143, %149 : vector<8x512xi1>, vector<8x512xbf16>
    %c2_90 = arith.constant 2 : index
    %c0_91 = arith.constant 0 : index
    %c0_92 = arith.constant 0 : index
    %153 = vector.load %arg5[%c2_90, %c0_91, %c0_92] : memref<9x8x8xbf16, #tpu.memory_space<vmem>>, vector<1x8x8xbf16>
    %154 = vector.shape_cast %153 : vector<1x8x8xbf16> to vector<8x8xbf16>
    %cst_93 = arith.constant dense<0.000000e+00> : vector<8x512xf32>
    %155 = tpu.matmul %154, %152, %cst_93 {dimension_numbers = #tpu.dot_dimension_numbers<[1], [0], [0], [1], [0, 0, 1, 1], [], []>} : vector<8x8xbf16>, vector<8x512xbf16>, vector<8x512xf32> -> vector<8x512xf32>
    %156 = arith.addf %142, %155 : vector<8x512xf32>
    %c0_94 = arith.constant 0 : index
    %c127_95 = arith.constant 127 : index
    %157 = vector.load %arg10[%c0_94, %c127_95] : memref<8x768xbf16, #tpu.memory_space<vmem>>, vector<8x512xbf16>
    %c1_i32_96 = arith.constant 1 : i32
    %158 = vector.broadcast %c1_i32_96 : i32 to vector<1x512xi32>
    %159 = arith.cmpi sge, %2, %158 : vector<1x512xi32>
    %cst_97 = arith.constant 0.000000e+00 : bf16
    %160 = vector.broadcast %cst_97 : bf16 to vector<8x512xbf16>
    %161 = vector.shape_cast %159 : vector<1x512xi1> to vector<1x512xi1>
    %162 = vector.broadcast %161 : vector<1x512xi1> to vector<8x512xi1>
    %163 = arith.select %162, %157, %160 : vector<8x512xi1>, vector<8x512xbf16>
    %c3_98 = arith.constant 3 : index
    %c0_99 = arith.constant 0 : index
    %c0_100 = arith.constant 0 : index
    %164 = vector.load %arg5[%c3_98, %c0_99, %c0_100] : memref<9x8x8xbf16, #tpu.memory_space<vmem>>, vector<1x8x8xbf16>
    %165 = vector.shape_cast %164 : vector<1x8x8xbf16> to vector<8x8xbf16>
    %cst_101 = arith.constant dense<0.000000e+00> : vector<8x512xf32>
    %166 = tpu.matmul %165, %163, %cst_101 {dimension_numbers = #tpu.dot_dimension_numbers<[1], [0], [0], [1], [0, 0, 1, 1], [], []>} : vector<8x8xbf16>, vector<8x512xbf16>, vector<8x512xf32> -> vector<8x512xf32>
    %167 = arith.addf %156, %166 : vector<8x512xf32>
    %c0_102 = arith.constant 0 : index
    %c128_103 = arith.constant 128 : index
    %168 = vector.load %arg10[%c0_102, %c128_103] : memref<8x768xbf16, #tpu.memory_space<vmem>>, vector<8x512xbf16>
    %c4_104 = arith.constant 4 : index
    %c0_105 = arith.constant 0 : index
    %c0_106 = arith.constant 0 : index
    %169 = vector.load %arg5[%c4_104, %c0_105, %c0_106] : memref<9x8x8xbf16, #tpu.memory_space<vmem>>, vector<1x8x8xbf16>
    %170 = vector.shape_cast %169 : vector<1x8x8xbf16> to vector<8x8xbf16>
    %cst_107 = arith.constant dense<0.000000e+00> : vector<8x512xf32>
    %171 = tpu.matmul %170, %168, %cst_107 {dimension_numbers = #tpu.dot_dimension_numbers<[1], [0], [0], [1], [0, 0, 1, 1], [], []>} : vector<8x8xbf16>, vector<8x512xbf16>, vector<8x512xf32> -> vector<8x512xf32>
    %172 = arith.addf %167, %171 : vector<8x512xf32>
    %c0_108 = arith.constant 0 : index
    %c129_109 = arith.constant 129 : index
    %173 = vector.load %arg10[%c0_108, %c129_109] : memref<8x768xbf16, #tpu.memory_space<vmem>>, vector<8x512xbf16>
    %c15_i32_110 = arith.constant 15 : i32
    %174 = vector.broadcast %c15_i32_110 : i32 to vector<1x512xi32>
    %175 = arith.cmpi slt, %2, %174 : vector<1x512xi32>
    %cst_111 = arith.constant 0.000000e+00 : bf16
    %176 = vector.broadcast %cst_111 : bf16 to vector<8x512xbf16>
    %177 = vector.shape_cast %175 : vector<1x512xi1> to vector<1x512xi1>
    %178 = vector.broadcast %177 : vector<1x512xi1> to vector<8x512xi1>
    %179 = arith.select %178, %173, %176 : vector<8x512xi1>, vector<8x512xbf16>
    %c5_112 = arith.constant 5 : index
    %c0_113 = arith.constant 0 : index
    %c0_114 = arith.constant 0 : index
    %180 = vector.load %arg5[%c5_112, %c0_113, %c0_114] : memref<9x8x8xbf16, #tpu.memory_space<vmem>>, vector<1x8x8xbf16>
    %181 = vector.shape_cast %180 : vector<1x8x8xbf16> to vector<8x8xbf16>
    %cst_115 = arith.constant dense<0.000000e+00> : vector<8x512xf32>
    %182 = tpu.matmul %181, %179, %cst_115 {dimension_numbers = #tpu.dot_dimension_numbers<[1], [0], [0], [1], [0, 0, 1, 1], [], []>} : vector<8x8xbf16>, vector<8x512xbf16>, vector<8x512xf32> -> vector<8x512xf32>
    %183 = arith.addf %172, %182 : vector<8x512xf32>
    %c0_116 = arith.constant 0 : index
    %c143_117 = arith.constant 143 : index
    %184 = vector.load %arg10[%c0_116, %c143_117] : memref<8x768xbf16, #tpu.memory_space<vmem>>, vector<8x512xbf16>
    %c15_i32_118 = arith.constant 15 : i32
    %185 = vector.broadcast %c15_i32_118 : i32 to vector<1x512xi32>
    %186 = arith.cmpi slt, %1, %185 : vector<1x512xi32>
    %c1_i32_119 = arith.constant 1 : i32
    %187 = vector.broadcast %c1_i32_119 : i32 to vector<1x512xi32>
    %188 = arith.cmpi sge, %2, %187 : vector<1x512xi32>
    %189 = arith.andi %186, %188 : vector<1x512xi1>
    %cst_120 = arith.constant 0.000000e+00 : bf16
    %190 = vector.broadcast %cst_120 : bf16 to vector<8x512xbf16>
    %191 = vector.shape_cast %189 : vector<1x512xi1> to vector<1x512xi1>
    %192 = vector.broadcast %191 : vector<1x512xi1> to vector<8x512xi1>
    %193 = arith.select %192, %184, %190 : vector<8x512xi1>, vector<8x512xbf16>
    %c6_121 = arith.constant 6 : index
    %c0_122 = arith.constant 0 : index
    %c0_123 = arith.constant 0 : index
    %194 = vector.load %arg5[%c6_121, %c0_122, %c0_123] : memref<9x8x8xbf16, #tpu.memory_space<vmem>>, vector<1x8x8xbf16>
    %195 = vector.shape_cast %194 : vector<1x8x8xbf16> to vector<8x8xbf16>
    %cst_124 = arith.constant dense<0.000000e+00> : vector<8x512xf32>
    %196 = tpu.matmul %195, %193, %cst_124 {dimension_numbers = #tpu.dot_dimension_numbers<[1], [0], [0], [1], [0, 0, 1, 1], [], []>} : vector<8x8xbf16>, vector<8x512xbf16>, vector<8x512xf32> -> vector<8x512xf32>
    %197 = arith.addf %183, %196 : vector<8x512xf32>
    %c0_125 = arith.constant 0 : index
    %c144_126 = arith.constant 144 : index
    %198 = vector.load %arg10[%c0_125, %c144_126] : memref<8x768xbf16, #tpu.memory_space<vmem>>, vector<8x512xbf16>
    %c15_i32_127 = arith.constant 15 : i32
    %199 = vector.broadcast %c15_i32_127 : i32 to vector<1x512xi32>
    %200 = arith.cmpi slt, %1, %199 : vector<1x512xi32>
    %cst_128 = arith.constant 0.000000e+00 : bf16
    %201 = vector.broadcast %cst_128 : bf16 to vector<8x512xbf16>
    %202 = vector.shape_cast %200 : vector<1x512xi1> to vector<1x512xi1>
    %203 = vector.broadcast %202 : vector<1x512xi1> to vector<8x512xi1>
    %204 = arith.select %203, %198, %201 : vector<8x512xi1>, vector<8x512xbf16>
    %c7_129 = arith.constant 7 : index
    %c0_130 = arith.constant 0 : index
    %c0_131 = arith.constant 0 : index
    %205 = vector.load %arg5[%c7_129, %c0_130, %c0_131] : memref<9x8x8xbf16, #tpu.memory_space<vmem>>, vector<1x8x8xbf16>
    %206 = vector.shape_cast %205 : vector<1x8x8xbf16> to vector<8x8xbf16>
    %cst_132 = arith.constant dense<0.000000e+00> : vector<8x512xf32>
    %207 = tpu.matmul %206, %204, %cst_132 {dimension_numbers = #tpu.dot_dimension_numbers<[1], [0], [0], [1], [0, 0, 1, 1], [], []>} : vector<8x8xbf16>, vector<8x512xbf16>, vector<8x512xf32> -> vector<8x512xf32>
    %208 = arith.addf %197, %207 : vector<8x512xf32>
    %c0_133 = arith.constant 0 : index
    %c145_134 = arith.constant 145 : index
    %209 = vector.load %arg10[%c0_133, %c145_134] : memref<8x768xbf16, #tpu.memory_space<vmem>>, vector<8x512xbf16>
    %c15_i32_135 = arith.constant 15 : i32
    %210 = vector.broadcast %c15_i32_135 : i32 to vector<1x512xi32>
    %211 = arith.cmpi slt, %1, %210 : vector<1x512xi32>
    %c15_i32_136 = arith.constant 15 : i32
    %212 = vector.broadcast %c15_i32_136 : i32 to vector<1x512xi32>
    %213 = arith.cmpi slt, %2, %212 : vector<1x512xi32>
    %214 = arith.andi %211, %213 : vector<1x512xi1>
    %cst_137 = arith.constant 0.000000e+00 : bf16
    %215 = vector.broadcast %cst_137 : bf16 to vector<8x512xbf16>
    %216 = vector.shape_cast %214 : vector<1x512xi1> to vector<1x512xi1>
    %217 = vector.broadcast %216 : vector<1x512xi1> to vector<8x512xi1>
    %218 = arith.select %217, %209, %215 : vector<8x512xi1>, vector<8x512xbf16>
    %c8_138 = arith.constant 8 : index
    %c0_139 = arith.constant 0 : index
    %c0_140 = arith.constant 0 : index
    %219 = vector.load %arg5[%c8_138, %c0_139, %c0_140] : memref<9x8x8xbf16, #tpu.memory_space<vmem>>, vector<1x8x8xbf16>
    %220 = vector.shape_cast %219 : vector<1x8x8xbf16> to vector<8x8xbf16>
    %cst_141 = arith.constant dense<0.000000e+00> : vector<8x512xf32>
    %221 = tpu.matmul %220, %218, %cst_141 {dimension_numbers = #tpu.dot_dimension_numbers<[1], [0], [0], [1], [0, 0, 1, 1], [], []>} : vector<8x8xbf16>, vector<8x512xbf16>, vector<8x512xf32> -> vector<8x512xf32>
    %222 = arith.addf %208, %221 : vector<8x512xf32>
    %c0_142 = arith.constant 0 : index
    %c0_143 = arith.constant 0 : index
    %223 = vector.load %arg6[%c0_142, %c0_143] : memref<8x1xf32, #tpu.memory_space<vmem>>, vector<8x1xf32>
    %224 = vector.broadcast %223 : vector<8x1xf32> to vector<8x512xf32>
    %225 = arith.addf %222, %224 : vector<8x512xf32>
    %c0_144 = arith.constant 0 : index
    %c0_145 = arith.constant 0 : index
    %226 = vector.load %arg7[%c0_144, %c0_145] : memref<8x4xbf16, #tpu.memory_space<vmem>>, vector<8x4xbf16>
    %cst_146 = arith.constant dense<0.000000e+00> : vector<8x512xf32>
    %227 = tpu.matmul %226, %0, %cst_146 {dimension_numbers = #tpu.dot_dimension_numbers<[1], [0], [0], [1], [0, 0, 1, 1], [], []>} : vector<8x4xbf16>, vector<4x512xbf16>, vector<8x512xf32> -> vector<8x512xf32>
    %c0_147 = arith.constant 0 : index
    %c0_148 = arith.constant 0 : index
    %228 = vector.load %arg8[%c0_147, %c0_148] : memref<8x1xf32, #tpu.memory_space<vmem>>, vector<8x1xf32>
    %229 = vector.broadcast %228 : vector<8x1xf32> to vector<8x512xf32>
    %230 = arith.addf %227, %229 : vector<8x512xf32>
    %231 = arith.addf %230, %225 : vector<8x512xf32>
    %cst_149 = arith.constant 0.000000e+00 : f32
    %232 = vector.broadcast %cst_149 : f32 to vector<8x512xf32>
    %233 = arith.maximumf %231, %232 : vector<8x512xf32>
    %c0_150 = arith.constant 0 : index
    %c0_151 = arith.constant 0 : index
    %234 = vector.load %arg9[%c0_150, %c0_151] : memref<8x512xf32, #tpu.memory_space<vmem>>, vector<8x512xf32>
    tpu.vector_store %arg9[%c0_150, %c0_151], %233 {strides = array<i32>} : memref<8x512xf32, #tpu.memory_space<vmem>>, vector<8x512xf32>,
    return
  }
  func.func @transform_0(%arg0: i32) -> (i32, i32) {
    %c0_i32 = arith.constant 0 : i32
    %c0_i32_0 = arith.constant 0 : i32
    return %c0_i32, %arg0 : i32, i32
  }
  func.func @transform_1(%arg0: i32) -> (i32, i32) {
    %c0_i32 = arith.constant 0 : i32
    %c0_i32_0 = arith.constant 0 : i32
    %c0_i32_1 = arith.constant 0 : i32
    return %c0_i32, %c0_i32_0 : i32, i32
  }
  func.func @transform_2(%arg0: i32) -> (i32, i32, i32) {
    %c0_i32 = arith.constant 0 : i32
    %c0_i32_0 = arith.constant 0 : i32
    %c0_i32_1 = arith.constant 0 : i32
    %c0_i32_2 = arith.constant 0 : i32
    return %c0_i32, %c0_i32_0, %c0_i32_1 : i32, i32, i32
  }
  func.func @transform_3(%arg0: i32) -> (i32, i32) {
    %c0_i32 = arith.constant 0 : i32
    %c0_i32_0 = arith.constant 0 : i32
    %c0_i32_1 = arith.constant 0 : i32
    return %c0_i32, %c0_i32_0 : i32, i32
  }
  func.func @transform_4(%arg0: i32) -> (i32, i32, i32) {
    %c0_i32 = arith.constant 0 : i32
    %c0_i32_0 = arith.constant 0 : i32
    %c0_i32_1 = arith.constant 0 : i32
    %c0_i32_2 = arith.constant 0 : i32
    return %c0_i32, %c0_i32_0, %c0_i32_1 : i32, i32, i32
  }
  func.func @transform_5(%arg0: i32) -> (i32, i32) {
    %c0_i32 = arith.constant 0 : i32
    %c0_i32_0 = arith.constant 0 : i32
    %c0_i32_1 = arith.constant 0 : i32
    return %c0_i32, %c0_i32_0 : i32, i32
  }
  func.func @transform_6(%arg0: i32) -> (i32, i32) {
    %c0_i32 = arith.constant 0 : i32
    %c0_i32_0 = arith.constant 0 : i32
    %c0_i32_1 = arith.constant 0 : i32
    return %c0_i32, %c0_i32_0 : i32, i32
  }
  func.func @transform_7(%arg0: i32) -> (i32, i32) {
    %c0_i32 = arith.constant 0 : i32
    %c0_i32_0 = arith.constant 0 : i32
    %c0_i32_1 = arith.constant 0 : i32
    return %c0_i32, %c0_i32_0 : i32, i32
  }
  func.func @transform_8(%arg0: i32) -> (i32, i32) {
    %c0_i32 = arith.constant 0 : i32
    %c0_i32_0 = arith.constant 0 : i32
    return %c0_i32, %arg0 : i32, i32
  }
}

</mosaic_0001>

<bundles_post_ra>
// kernel: tpu_custom_call.1
= control target key start
LH: loop header
LB: loop body
LE: loop exit
PB: predicated region body
PF: predicated region fallthrough
CT: control target
= control target key end

     0   :  { %v42_v1 = vlaneseq  ;;  %v3213_v3 = vmov 0   ;;  %s4209_s0 = inlined_call_operand.vmem [shape: bf16[4,512], index: 0, kind: input, shape index: {}]   ;;  %s4210_s1 = inlined_call_operand.vmem [shape: s32[2,512], index: 1, kind: input, shape index: {}]   ;;  %s4211_s2 = inlined_call_operand.vmem [shape: bf16[9,8,4], index: 2, kind: input, shape index: {}]   ;;  %s4212_s3 = inlined_call_operand.vmem [shape: f32[8,1], index: 3, kind: input, shape index: {}]   ;;  %s4213_s4 = inlined_call_operand.vmem [shape: bf16[9,8,8], index: 4, kind: input, shape index: {}]   ;;  %s4214_s5 = inlined_call_operand.vmem [shape: f32[8,1], index: 5, kind: input, shape index: {}]   ;;  %s4215_s6 = inlined_call_operand.vmem [shape: bf16[8,4], index: 6, kind: input, shape index: {}]   ;;  %s4216_s7 = inlined_call_operand.vmem [shape: f32[8,1], index: 7, kind: input, shape index: {}]   ;;  %s4217_s8 = inlined_call_operand.hbm [shape: f32[8,512], index: 8, kind: output, shape index: {}]  }
   0x1   :  { %v3272_v0 = vld [vmem:[%s4210_s1] ss:$2 sm:$0xf]  ;;  %v3278_v2 = vld [vmem:[%s4210_s1 + $0x1] ss:$2 sm:$0xf]  ;;  %226 = vmatprep.mubr.bf16.mxu0 %v3213_v3  ;;  %267 = vmatprep.mubr.bf16.mxu1 %v3213_v3 }
   0x2   :  { %vm60_vm0 = vcmp.ge.s32.totalorder %v3272_v0, 1  ;;  %v3282_v4 = vshrl.u32 %v42_v1, 7  ;;  %vm61_vm1 = vcmp.ge.s32.totalorder %v3278_v2, 1  ;;  %vm401_vm2 = vcmp.lt.s32.totalorder %v3278_v2, 15  ;;  %3178 = vset.pattern.permute.xlu0 %v3213_v3  ;;  %3179 = vset.pattern.permute.xlu1 %v3213_v3  ;;  %v3318_v11 = vld [vmem:[%s4209_s0] sm:$0xff] }
   0x3   :  { %v106_v5 = vsel %vm60_vm0, 1, %v3213_v3  ;;  %vm1035_vm3 = vcmp.lt.s32.totalorder %v3272_v0, 15  ;;  %vm62_vm4 = vmand %vm60_vm0, %vm61_vm1  ;;  %v3299_v6 = vsel %vm61_vm1, 1, %v3213_v3  ;;  %v3327_v14 = vsel %vm401_vm2, 1, %v3213_v3 }
   0x4   :  { %v3302_v7 = vsub.s32 0, %v3282_v4  ;;  %v3305_v8 = vsub.s32 1, %v3282_v4  ;;  %v63_v9 = vsel %vm62_vm4, 1, %v3213_v3  ;;  %v3309_v10 = vsub.s32 2, %v3282_v4  ;;  %vm402_vm5 = vmand %vm60_vm0, %vm401_vm2 }
   0x5   :  { %v3321_v12 = vsub.s32 3, %v3282_v4  ;;  %v403_v13 = vsel %vm402_vm5, 1, %v3213_v3  ;;  %v3331_v15 = vcombine.high %v3318_v11, %v3318_v11  ;;  %2901 = vst.sshfl [vmem:[#allocation2 + $0x4] sm:$0xf pattern:$0x76325410] %v3318_v11 }
   0x6   :  { %v110_v16 = vrot.slane %v106_v5, %v3302_v7  ;;  %v114_v17 = vrot.slane %v106_v5, %v3305_v8  ;;  %v67_v18 = vrot.slane %v63_v9, %v3302_v7  ;;  %v71_v19 = vrot.slane %v63_v9, %v3305_v8 }
   0x7   :  { %v118_v20 = vrot.slane %v106_v5, %v3309_v10  ;;  %v122_v21 = vrot.slane %v106_v5, %v3321_v12  ;;  %v75_v22 = vrot.slane %v63_v9, %v3309_v10  ;;  %v79_v23 = vrot.slane %v63_v9, %v3321_v12  ;;  %2902 = vst.sshfl [vmem:[#allocation2 + $0xc] sm:$0xf pattern:$0x76325410] %v3331_v15 }
   0x8   :  { %13 = vsyncpa [#allocation4], 0  ;;  %vm123_vm6 = vcmp.eq.s32.totalorder %v110_v16, 1  ;;  %vm124_vm7 = vcmp.eq.s32.totalorder %v114_v17, 1  ;;  %vm3343_vm8 = vcmp.eq.s32.totalorder %v67_v18, 1  ;;  %vm81_vm9 = vcmp.eq.s32.totalorder %v71_v19, 1 }
   0x9   :  { %vm3351_vm10 = vmand %vm1035_vm3, %vm61_vm1  ;;  %vm3355_vm12 = vcmp.eq.s32.totalorder %v118_v20, 1  ;;  %vm3359_vm13 = vcmp.eq.s32.totalorder %v122_v21, 1  ;;  %vm3363_vm14 = vcmp.eq.s32.totalorder %v75_v22, 1  ;;  %vm3367_vm15 = vcmp.eq.s32.totalorder %v79_v23, 1  ;;  %s3214_s0 = smov 112   ;;  %s3215_s10 = smov 111  }
   0xa   :  { %vm127_vm11 = vmpackc.low %vm124_vm7, %vm123_vm6  ;;  %v407_v31 = vrot.slane %v403_v13, %v3302_v7  ;;  %v411_v32 = vrot.slane %v403_v13, %v3305_v8  ;;  %v415_v33 = vrot.slane %v403_v13, %v3309_v10  ;;  %v419_v35 = vrot.slane %v403_v13, %v3321_v12  ;;  %s3216_s11 = smov 113   ;;  %s3217_s12 = smov 127  }
   0xb   :  { %v129_v30 = vsel %vm127_vm11, 65537, %v3213_v3  ;;  %vm84_vm0 = vmpackc.low %vm81_vm9, %vm3343_vm8  ;;  %v579_v36 = vrot.slane %v3299_v6, %v3302_v7  ;;  %v583_v37 = vrot.slane %v3299_v6, %v3305_v8  ;;  %v587_v46 = vrot.slane %v3299_v6, %v3309_v10  ;;  %s3218_s13 = smov 1   ;;  %s3219_s14 = smov 15  }
   0xc   :  { %131 = vrot.lane.b32.xlu0 %v129_v30, %s3214_s0  ;;  %v86_v34 = vsel %vm84_vm0, 65537, %v3213_v3  ;;  %vm128_vm1 = vmpackc.low %vm3359_vm13, %vm3355_vm12  ;;  %vm3394_vm5 = vcmp.eq.s32.totalorder %v407_v31, 1  ;;  %vm3398_vm6 = vcmp.eq.s32.totalorder %v411_v32, 1  ;;  %vm3402_vm7 = vcmp.eq.s32.totalorder %v415_v33, 1  ;;  %s3220_s15 = smov 16   ;;  %s3221_s16 = smov 17  }
   0xd   :  { %88 = vrot.lane.b32.xlu1 %v86_v34, %s3215_s10  ;;  %v130_v38 = vsel %vm128_vm1, 65537, %v3213_v3  ;;  %vm85_vm4 = vmpackc.low %vm3367_vm15, %vm3363_vm14  ;;  %vm3411_vm9 = vcmp.eq.s32.totalorder %v419_v35, 1  ;;  %vm3415_vm11 = vcmp.eq.s32.totalorder %v579_v36, 1  ;;  %vm3423_vm13 = vcmp.eq.s32.totalorder %v583_v37, 1  ;;  %v57_v43 = vld [vmem:[#allocation2] sm:$0x33] }
   0xe   :  { %v87_v42 = vsel %vm85_vm4, 65537, %v3213_v3  ;;  %vm424_vm8 = vmpackc.low %vm3398_vm6, %vm3394_vm5  ;;  %v591_v47 = vrot.slane %v3299_v6, %v3321_v12  ;;  %v869_v48 = vrot.slane %v3327_v14, %v3302_v7  ;;  %v873_v49 = vrot.slane %v3327_v14, %v3305_v8  ;;  %v3579_v41 = vld [vmem:[#allocation2 + $0x10] sm:$0x3]  ;;  %v3610_v59 = vld [vmem:[#allocation2 + $0x8] sm:$0x33] }
   0xf   :  { %vm425_vm12 = vmpackc.low %vm3411_vm9, %vm3402_vm7  ;;  %v877_v50 = vrot.slane %v3327_v14, %v3309_v10  ;;  %v881_v51 = vrot.slane %v3327_v14, %v3321_v12  ;;  %v426_v52 = vsel %vm424_vm8, 65537, %v3213_v3  ;;  %vm3442_vm14 = vcmp.eq.s32.totalorder %v587_v46, 1 }
  0x10   :  { %133 = vrot.lane.b32.xlu0 %v130_v38, %s3214_s0  ;;  %vm3446_vm15 = vcmp.eq.s32.totalorder %v591_v47, 1  ;;  %v427_v55 = vsel %vm425_vm12, 65537, %v3213_v3  ;;  %vm596_vm0 = vmpackc.low %vm3423_vm13, %vm3415_vm11  ;;  %vm3455_vm1 = vcmp.eq.s32.totalorder %v869_v48, 1  ;;  %v1037_v57 = vsel %vm3351_vm10, 1, %v3213_v3 }
  0x11   :  { %90 = vrot.lane.b32.xlu1 %v87_v42, %s3215_s10  ;;  %v1207_v58 = vsel %vm1035_vm3, 1, %v3213_v3  ;;  %vm597_vm4 = vmpackc.low %vm3446_vm15, %vm3442_vm14  ;;  %vm3469_vm5 = vcmp.eq.s32.totalorder %v873_v49, 1  ;;  %v1041_v60 = vrot.slane %v1037_v57, %v3302_v7  ;;  %v1045_v61 = vrot.slane %v1037_v57, %v3305_v8 }
  0x12   :  { %v1049_v62 = vrot.slane %v1037_v57, %v3309_v10  ;;  %vm3477_vm10 = vcmp.eq.s32.totalorder %v877_v50, 1  ;;  %vm3481_vm6 = vcmp.eq.s32.totalorder %v881_v51, 1  ;;  %v1053_v5 = vrot.slane %v1037_v57, %v3321_v12  ;;  %vm1377_vm7 = vmand %vm1035_vm3, %vm401_vm2 }
  0x13   :  { %v598_v6 = vsel %vm596_vm0, 65537, %v3213_v3  ;;  %v599_v9 = vsel %vm597_vm4, 65537, %v3213_v3  ;;  %vm886_vm8 = vmpackc.low %vm3469_vm5, %vm3455_vm1  ;;  %v1211_v13 = vrot.slane %v1207_v58, %v3302_v7  ;;  %vm3502_vm11 = vcmp.eq.s32.totalorder %v1041_v60, 1 }
  0x14   :  { %428 = vrot.lane.b32.xlu0 %v426_v52, %s3216_s11  ;;  %vm887_vm9 = vmpackc.low %vm3481_vm6, %vm3477_vm10  ;;  %vm3506_vm12 = vcmp.eq.s32.totalorder %v1045_v61, 1  ;;  %vm3510_vm2 = vcmp.eq.s32.totalorder %v1049_v62, 1  ;;  %v1215_v16 = vrot.slane %v1207_v58, %v3305_v8  ;;  %vm3516_vm3 = vcmp.eq.s32.totalorder %v1053_v5, 1 }
  0x15   :  { %430 = vrot.lane.b32.xlu1 %v427_v55, %s3216_s11  ;;  %v1219_v18 = vrot.slane %v1207_v58, %v3309_v10  ;;  %v1223_v19 = vrot.slane %v1207_v58, %v3321_v12  ;;  %v1378_v20 = vsel %vm1377_vm7, 1, %v3213_v3  ;;  %v888_v21 = vsel %vm886_vm8, 65537, %v3213_v3  ;;  %vm1058_vm13 = vmpackc.low %vm3506_vm12, %vm3502_vm11 }
  0x16   :  { %v889_v22 = vsel %vm887_vm9, 65537, %v3213_v3  ;;  %vm1059_vm14 = vmpackc.low %vm3516_vm3, %vm3510_vm2  ;;  %vm3534_vm15 = vcmp.eq.s32.totalorder %v1211_v13, 1  ;;  %vm3538_vm0 = vcmp.eq.s32.totalorder %v1215_v16, 1  ;;  %v1382_v25 = vrot.slane %v1378_v20, %v3302_v7 }
  0x17   :  { %v1386_v26 = vrot.slane %v1378_v20, %v3305_v8  ;;  %vm3545_vm1 = vcmp.eq.s32.totalorder %v1219_v18, 1  ;;  %vm3549_vm4 = vcmp.eq.s32.totalorder %v1223_v19, 1  ;;  %v1390_v29 = vrot.slane %v1378_v20, %v3309_v10  ;;  %vm1228_vm5 = vmpackc.low %vm3538_vm0, %vm3534_vm15 }
  0x18   :  { %600 = vrot.lane.b32.xlu0 %v598_v6, %s3217_s12  ;;  %v1394_v30 = vrot.slane %v1378_v20, %v3321_v12  ;;  %v1060_v7 = vsel %vm1058_vm13, 65537, %v3213_v3  ;;  %v1061_v8 = vsel %vm1059_vm14, 65537, %v3213_v3  ;;  %vm1229_vm10 = vmpackc.low %vm3549_vm4, %vm3545_vm1  ;;  %vm1395_vm6 = vcmp.eq.s32.totalorder %v1382_v25, 1 }
  0x19   :  { %602 = vrot.lane.b32.xlu1 %v599_v9, %s3217_s12  ;;  %vm1396_vm7 = vcmp.eq.s32.totalorder %v1386_v26, 1  ;;  %vm1397_vm8 = vcmp.eq.s32.totalorder %v1390_v29, 1  ;;  %v1230_v10 = vsel %vm1228_vm5, 65537, %v3213_v3  ;;  %v1231_v12 = vsel %vm1229_vm10, 65537, %v3213_v3 }
  0x1a   :  { %vm1398_vm9 = vcmp.eq.s32.totalorder %v1394_v30, 1  ;;  %vm1399_vm11 = vmpackc.low %vm1396_vm7, %vm1395_vm6  ;;  %vm4230_vm2 = vcmask 916480   ;;  %vm4228_vm3 = vcmask 908288   ;;  %vm4234_vm13 = vcmask 1043456  }
  0x1b   :  { %vm1400_vm12 = vmpackc.low %vm1398_vm9, %vm1397_vm8  ;;  %v1401_v31 = vsel %vm1399_vm11, 65537, %v3213_v3  ;;  %vm4238_vm4 = vcmask 924672   ;;  %vm4237_vm6 = vcmask 1039360  }
  0x1c   :  { %890 = vrot.lane.b32.xlu0 %v888_v21, %s3218_s13  ;;  %v1402_v32 = vsel %vm1400_vm12, 65537, %v3213_v3 }
  0x1d   :  { %892 = vrot.lane.b32.xlu1 %v889_v22, %s3218_s13 }
  0x20   :  { %1062 = vrot.lane.b32.xlu0 %v1060_v7, %s3219_s14 }
  0x21   :  { %1064 = vrot.lane.b32.xlu1 %v1061_v8, %s3219_s14 }
  0x24   :  { %1232 = vrot.lane.b32.xlu0 %v1230_v10, %s3220_s15 }
  0x25   :  { %1234 = vrot.lane.b32.xlu1 %v1231_v12, %s3220_s15 }
  0x28   :  { %1403 = vrot.lane.b32.xlu0 %v1401_v31, %s3221_s16 }
  0x29   :  { %1405 = vrot.lane.b32.xlu1 %v1402_v32, %s3221_s16 }
  0x7e   :  { %v132_v33 = vpop.permute.xlu0 %131 }
  0x7f   :  { %v135_v34 = vrot.slane %v132_v33, 4  ;;  %v89_v35 = vpop.permute.xlu1 %88 }
  0x80   :  { %v92_v37 = vrot.slane %v89_v35, 4 }
  0x81   :  { %v3577_v36 = vsel %vm4230_vm2, %v135_v34, %v132_v33 }
  0x82   :  { %v134_v38 = vpop.permute.xlu0 %133  ;;  %vm4226_vm14 = vcmp.ne.s16.totalorder %v3577_v36, 0  ;;  %v3587_v45 = vsel %vm4228_vm3, %v92_v37, %v89_v35 }
  0x83   :  { %v136_v39 = vrot.slane %v134_v38, 4  ;;  %v91_v40 = vpop.permute.xlu1 %90  ;;  %v144_v52 = vsel %vm4226_vm14, %v57_v43, 0  ;;  %vm4222_vm1 = vcmp.ne.s16.totalorder %v3587_v45, 0 }
  0x84   :  { %v93_v42 = vrot.slane %v91_v40, 4  ;;  %v2904_v56 = vcombine.low %v144_v52, %v144_v52  ;;  %v102_v57 = vsel %vm4222_vm1, %v57_v43, 0  ;;  %v2905_v58 = vcombine.high %v144_v52, %v144_v52 }
  0x85   :  { %vm3582_vm15 = vcmp.ne.s16.totalorder %v136_v39, 0  ;;  %v139_v48 = vsel %vm4234_vm13, %v135_v34, %v136_v39  ;;  %v2914_v62 = vcombine.high %v102_v57, %v102_v57  ;;  %v2913_v5 = vcombine.low %v102_v57, %v102_v57 }
  0x86   :  { %vm3589_vm0 = vcmp.ne.s16.totalorder %v93_v42, 0  ;;  %v146_v47 = vsel %vm3582_vm15, %v3579_v41, 0  ;;  %v429_v51 = vpop.permute.xlu0 %428  ;;  %v3605_v54 = vsel %vm4230_vm2, %v139_v48, %v134_v38  ;;  %v97_v61 = vsel %vm4234_vm13, %v92_v37, %v93_v42 }
  0x87   :  { %v2908_v49 = vcombine.low %v146_v47, %v146_v47  ;;  %v104_v50 = vsel %vm3589_vm0, %v3579_v41, 0  ;;  %v432_v55 = vrot.slane %v429_v51, 4  ;;  %vm4224_vm5 = vcmp.ne.s16.totalorder %v3605_v54, 0  ;;  %v431_v1 = vpop.permute.xlu1 %430 }
  0x88   :  { %v2917_v53 = vcombine.low %v104_v50, %v104_v50  ;;  %v145_v63 = vsel %vm4224_vm5, %v3610_v59, 0  ;;  %v3625_v9 = vsel %vm4228_vm3, %v97_v61, %v91_v40  ;;  %v433_v13 = vrot.slane %v431_v1, 4 }
  0x89   :  { %170 = vrot.lane.b32.xlu0 %v2908_v49, %s3220_s15  ;;  %v3616_v60 = vsel %vm4238_vm4, %v432_v55, %v429_v51  ;;  %v2906_v14 = vcombine.low %v145_v63, %v145_v63  ;;  %v2907_v16 = vcombine.high %v145_v63, %v145_v63  ;;  %vm4221_vm7 = vcmp.ne.s16.totalorder %v3625_v9, 0 }
  0x8a   :  { %297 = vrot.lane.b32.xlu1 %v2917_v53, %s3221_s16  ;;  %v601_v6 = vpop.permute.xlu0 %600  ;;  %vm4220_vm10 = vcmp.ne.s16.totalorder %v3616_v60, 0  ;;  %v436_v17 = vsel %vm4234_vm13, %v432_v55, %v433_v13  ;;  %vm3634_vm8 = vcmp.ne.s16.totalorder %v433_v13, 0  ;;  %v103_v21 = vsel %vm4221_vm7, %v3610_v59, 0  ;;  %v3695_v55 = vld [vmem:[#allocation2 + $0x14] sm:$0x3] }
  0x8b   :  { %v604_v0 = vrot.slane %v601_v6, 4  ;;  %v441_v2 = vsel %vm4220_vm10, %v57_v43, 0  ;;  %v603_v22 = vpop.permute.xlu1 %602  ;;  %v3646_v24 = vsel %vm4238_vm4, %v436_v17, %v431_v1  ;;  %v443_v25 = vsel %vm3634_vm8, %v3579_v41, 0  ;;  %v863_v17 = vld [vmem:[#allocation2 + $0xc] sm:$0x33] }
  0x8c   :  { %v2923_v20 = vcombine.low %v441_v2, %v441_v2  ;;  %v2924_v23 = vcombine.high %v441_v2, %v441_v2  ;;  %v605_v26 = vrot.slane %v603_v22, 4  ;;  %v2916_v27 = vcombine.high %v103_v21, %v103_v21 }
  0x8d   :  { %162 = vrot.lane.b32.xlu0 %v2904_v56, %s3220_s15  ;;  %v3639_v19 = vsel %vm4237_vm6, %v604_v0, %v601_v6  ;;  %v2915_v28 = vcombine.low %v103_v21, %v103_v21  ;;  %vm4219_vm11 = vcmp.ne.s16.totalorder %v3646_v24, 0  ;;  %v2927_v30 = vcombine.low %v443_v25, %v443_v25 }
  0x8e   :  { %164 = vrot.lane.b32.xlu1 %v2905_v58, %s3220_s15  ;;  %vm4218_vm9 = vcmp.ne.s16.totalorder %v3639_v19, 0  ;;  %v891_v7 = vpop.permute.xlu0 %890  ;;  %v608_v8 = vsel %vm4234_vm13, %v604_v0, %v605_v26  ;;  %v442_v10 = vsel %vm4219_vm11, %v3610_v59, 0  ;;  %vm3662_vm12 = vcmp.ne.s16.totalorder %v605_v26, 0 }
  0x8f   :  { %v613_v29 = vsel %vm4218_vm9, %v57_v43, 0  ;;  %v3668_v32 = vsel %vm4237_vm6, %v608_v8, %v603_v22  ;;  %v894_v33 = vrot.slane %v891_v7, 4  ;;  %v2925_v34 = vcombine.low %v442_v10, %v442_v10  ;;  %v893_v39 = vpop.permute.xlu1 %892 }
  0x90   :  { %v2933_v31 = vcombine.low %v613_v29, %v613_v29  ;;  %vm4239_vm9 = vcmask 7168   ;;  %v615_v35 = vsel %vm3662_vm12, %v3579_v41, 0  ;;  %v2926_v37 = vcombine.high %v442_v10, %v442_v10  ;;  %v3683_v41 = vld [vmem:[#allocation2 + $0x4] sm:$0x33] }
  0x91   :  { %291 = vrot.lane.b32.xlu0 %v2914_v62, %s3221_s16  ;;  %vm4223_vm11 = vcmp.ne.s16.totalorder %v3668_v32, 0  ;;  %v3678_v40 = vsel %vm4239_vm9, %v894_v33, %v891_v7  ;;  %v2937_v42 = vcombine.low %v615_v35, %v615_v35  ;;  %v2934_v43 = vcombine.high %v613_v29, %v613_v29 }
  0x92   :  { %289 = vrot.lane.b32.xlu1 %v2913_v5, %s3221_s16  ;;  %v1063_v38 = vpop.permute.xlu0 %1062  ;;  %v614_v48 = vsel %vm4223_vm11, %v3610_v59, 0  ;;  %vm4240_vm10 = vcmask 121856   ;;  %vm4225_vm7 = vcmp.ne.s16.totalorder %v3678_v40, 0  ;;  %v895_v49 = vrot.slane %v893_v39, 4 }
  0x93   :  { %v1066_v47 = vrot.slane %v1063_v38, 4  ;;  %v1065_v52 = vpop.permute.xlu1 %1064  ;;  %v2936_v53 = vcombine.high %v614_v48, %v614_v48  ;;  %v902_v56 = vsel %vm4225_vm7, %v3683_v41, 0  ;;  %v2935_v57 = vcombine.low %v614_v48, %v614_v48 }
  0x94   :  { %vm3688_vm1 = vcmp.ne.s16.totalorder %v895_v49, 0  ;;  %v1067_v58 = vrot.slane %v1065_v52, 4  ;;  %v897_v61 = vsel %vm4234_vm13, %v894_v33, %v895_v49  ;;  %v2952_v62 = vcombine.low %v902_v56, %v902_v56 }
  0x95   :  { %166 = vrot.lane.b32.xlu0 %v2906_v14, %s3220_s15  ;;  %v3693_v51 = vsel %vm4240_vm10, %v1066_v47, %v1063_v38  ;;  %v904_v59 = vsel %vm3688_vm1, %v3695_v55, 0  ;;  %v2953_v5 = vcombine.high %v902_v56, %v902_v56  ;;  %v3716_v14 = vsel %vm4239_vm9, %v897_v61, %v893_v39 }
  0x96   :  { %168 = vrot.lane.b32.xlu1 %v2907_v16, %s3220_s15  ;;  %vm4227_vm11 = vcmp.ne.s16.totalorder %v3693_v51, 0  ;;  %v1233_v63 = vpop.permute.xlu0 %1232  ;;  %vm3707_vm5 = vcmp.ne.s16.totalorder %v1067_v58, 0  ;;  %v2956_v13 = vcombine.low %v904_v59, %v904_v59  ;;  %vm172_vm7 = vcmask 130048  }
  0x97   :  { %v1074_v6 = vsel %vm4227_vm11, %v3683_v41, 0  ;;  %v1236_v0 = vrot.slane %v1233_v63, 4  ;;  %v1076_v2 = vsel %vm3707_vm5, %v3695_v55, 0  ;;  %vm4229_vm14 = vcmp.ne.s16.totalorder %v3716_v14, 0 }
  0x98   :  { %v2962_v16 = vcombine.low %v1074_v6, %v1074_v6  ;;  %v2966_v21 = vcombine.low %v1076_v2, %v1076_v2  ;;  %v2963_v25 = vcombine.high %v1074_v6, %v1074_v6  ;;  %v903_v26 = vsel %vm4229_vm14, %v863_v17, 0 }
  0x99   :  { %459 = vrot.lane.b32.xlu0 %v2923_v20, %s3219_s14  ;;  %v3726_v20 = vsel %vm172_vm7, %v1236_v0, %v1233_v63  ;;  %vm299_vm3 = vcmask 138240   ;;  %v2954_v7 = vcombine.low %v903_v26, %v903_v26  ;;  %v2955_v10 = vcombine.high %v903_v26, %v903_v26 }
  0x9a   :  { %461 = vrot.lane.b32.xlu1 %v2924_v23, %s3219_s14  ;;  %v1404_v22 = vpop.permute.xlu0 %1403  ;;  %v1069_v23 = vsel %vm4234_vm13, %v1066_v47, %v1067_v58  ;;  %vm4231_vm11 = vcmp.ne.s16.totalorder %v3726_v20, 0 }
  0x9b   :  { %v3734_v29 = vsel %vm4240_vm10, %v1069_v23, %v1065_v52  ;;  %v1244_v8 = vsel %vm4231_vm11, %v3683_v41, 0 }
  0x9c   :  { %vm4232_vm14 = vcmp.ne.s16.totalorder %v3734_v29, 0  ;;  %v2973_v39 = vcombine.high %v1244_v8, %v1244_v8 }
  0x9d   :  { %295 = vrot.lane.b32.xlu0 %v2916_v27, %s3221_s16  ;;  %v1235_v27 = vpop.permute.xlu1 %1234  ;;  %v1075_v38 = vsel %vm4232_vm14, %v863_v17, 0 }
  0x9e   :  { %293 = vrot.lane.b32.xlu1 %v2915_v28, %s3221_s16  ;;  %v1407_v28 = vrot.slane %v1404_v22, 4  ;;  %v2965_v49 = vcombine.high %v1075_v38, %v1075_v38 }
  0xa1   :  { %467 = vrot.lane.b32.xlu0 %v2927_v30, %s3219_s14  ;;  %v1237_v30 = vrot.slane %v1235_v27, 4  ;;  %v1406_v33 = vpop.permute.xlu1 %1405 }
  0xa2   :  { %631 = vrot.lane.b32.xlu1 %v2933_v31, %s3218_s13  ;;  %v3743_v31 = vsel %vm299_vm3, %v1407_v28, %v1404_v22 }
  0xa3   :  { %vm3747_vm2 = vcmp.ne.s16.totalorder %v1237_v30, 0  ;;  %vm4233_vm11 = vcmp.ne.s16.totalorder %v3743_v31, 0 }
  0xa4   :  { %v1246_v47 = vsel %vm3747_vm2, %v3695_v55, 0  ;;  %v1415_v48 = vsel %vm4233_vm11, %v3683_v41, 0 }
  0xa5   :  { %463 = vrot.lane.b32.xlu0 %v2925_v34, %s3219_s14  ;;  %v1239_v34 = vsel %vm4234_vm13, %v1236_v0, %v1237_v30  ;;  %v2976_v56 = vcombine.low %v1246_v47, %v1246_v47 }
  0xa6   :  { %465 = vrot.lane.b32.xlu1 %v2926_v37, %s3219_s14  ;;  %v2972_v37 = vcombine.low %v1244_v8, %v1244_v8 }
  0xa9   :  { %633 = vrot.lane.b32.xlu0 %v2934_v43, %s3218_s13  ;;  %v3756_v43 = vsel %vm172_vm7, %v1239_v34, %v1235_v27  ;;  %v2903_v34 = vld [vmem:[%s4211_s2 + $0x4] sm:$0xf] }
  0xaa   :  { %639 = vrot.lane.b32.xlu1 %v2937_v42, %s3218_s13  ;;  %v1408_v42 = vrot.slane %v1406_v33, 4  ;;  %vm4236_vm14 = vcmp.ne.s16.totalorder %v3756_v43, 0 }
  0xab   :  { %v1245_v59 = vsel %vm4236_vm14, %v863_v17, 0  ;;  %vm177_vm14 = vcmask 31744  }
  0xac   :  { %v1410_v52 = vsel %vm4234_vm13, %v1407_v28, %v1408_v42  ;;  %v2974_v41 = vcombine.low %v1245_v59, %v1245_v59  ;;  %v2975_v61 = vcombine.high %v1245_v59, %v1245_v59  ;;  %vm3780_vm13 = vcmp.ne.s16.totalorder %v1408_v42, 0  ;;  %v105_v59 = vld [vmem:[%s4211_s2] sm:$0xf] }
  0xad   :  { %637 = vrot.lane.b32.xlu0 %v2936_v53, %s3218_s13  ;;  %v2964_v53 = vcombine.low %v1075_v38, %v1075_v38  ;;  %v3770_v58 = vsel %vm299_vm3, %v1410_v52, %v1406_v33 }
  0xae   :  { %635 = vrot.lane.b32.xlu1 %v2935_v57, %s3218_s13  ;;  %v2982_v57 = vcombine.low %v1415_v48, %v1415_v48  ;;  %vm4235_vm11 = vcmp.ne.s16.totalorder %v3770_v58, 0 }
  0xb1   :  { %920 = vrot.lane.b32.xlu0 %v2952_v62, %s3217_s12  ;;  %v1416_v62 = vsel %vm4235_vm11, %v863_v17, 0  ;;  %vm181_vm11 = vcmask 1041408  }
  0xb2   :  { %922 = vrot.lane.b32.xlu1 %v2953_v5, %s3217_s12  ;;  %v2983_v5 = vcombine.high %v1415_v48, %v1415_v48  ;;  %v2984_v6 = vcombine.low %v1416_v62, %v1416_v62  ;;  %v2985_v0 = vcombine.high %v1416_v62, %v1416_v62 }
  0xb5   :  { %928 = vrot.lane.b32.xlu0 %v2956_v13, %s3217_s12  ;;  %v1417_v13 = vsel %vm3780_vm13, %v3695_v55, 0 }
  0xb6   :  { %1092 = vrot.lane.b32.xlu1 %v2962_v16, %s3216_s11  ;;  %v2986_v2 = vcombine.low %v1417_v13, %v1417_v13  ;;  %v1548_v16 = vld [vmem:[%s4212_s3] sm:$0xff] }
  0xb9   :  { %1094 = vrot.lane.b32.xlu0 %v2963_v25, %s3216_s11 }
  0xba   :  { %1100 = vrot.lane.b32.xlu1 %v2966_v21, %s3216_s11 }
  0xbd   :  { %924 = vrot.lane.b32.xlu0 %v2954_v7, %s3217_s12 }
  0xbe   :  { %926 = vrot.lane.b32.xlu1 %v2955_v10, %s3217_s12 }
  0xc1   :  { %1262 = vrot.lane.b32.xlu0 %v2972_v37, %s3214_s0 }
  0xc2   :  { %1264 = vrot.lane.b32.xlu1 %v2973_v39, %s3214_s0 }
  0xc5   :  { %1098 = vrot.lane.b32.xlu0 %v2965_v49, %s3216_s11 }
  0xc6   :  { %1096 = vrot.lane.b32.xlu1 %v2964_v53, %s3216_s11 }
  0xc9   :  { %1270 = vrot.lane.b32.xlu0 %v2976_v56, %s3214_s0 }
  0xca   :  { %1433 = vrot.lane.b32.xlu1 %v2982_v57, %s3215_s10 }
  0xcd   :  { %1266 = vrot.lane.b32.xlu0 %v2974_v41, %s3214_s0 }
  0xce   :  { %1268 = vrot.lane.b32.xlu1 %v2975_v61, %s3214_s0 }
  0xd1   :  { %1435 = vrot.lane.b32.xlu0 %v2983_v5, %s3215_s10 }
  0xd2   :  { %1437 = vrot.lane.b32.xlu1 %v2984_v6, %s3215_s10 }
  0xd5   :  { %1439 = vrot.lane.b32.xlu0 %v2985_v0, %s3215_s10 }
  0xd6   :  { %1441 = vrot.lane.b32.xlu1 %v2986_v2, %s3215_s10 }
  0xd9   :  { %1551 = vperm.xlu0 %3178, %v1548_v16  }
  0xfb   :  { %v171_v17 = vpop.permute.xlu0 %170 }
  0xfc   :  { %v298_v21 = vpop.permute.xlu1 %297 }
  0xff   :  { %v163_v22 = vpop.permute.xlu0 %162 }
 0x100   :  { %v165_v23 = vpop.permute.xlu1 %164 }
 0x101   :  { %v173_v55 = vsel %vm172_vm7, %v163_v22, %v165_v23 }
 0x102   :  { %v183_v8 = vsel %vm181_vm11, %v173_v55, 0 }
 0x103   :  { %v292_v25 = vpop.permute.xlu0 %291 }
 0x104   :  { %v290_v26 = vpop.permute.xlu1 %289 }
 0x105   :  { %v300_v39 = vsel %vm299_vm3, %v290_v26, %v292_v25 }
 0x106   :  { %v308_v53 = vsel %vm181_vm11, %v300_v39, 0 }
 0x107   :  { %v167_v27 = vpop.permute.xlu0 %166 }
 0x108   :  { %v169_v28 = vpop.permute.xlu1 %168  ;;  %v174_v30 = vsel %vm172_vm7, %v165_v23, %v167_v27  ;;  %v747_v23 = vld [vmem:[#allocation2 + $0x4] sm:$0x33] }
 0x109   :  { %2909 = vmatprep.subr.msk.bf16.mxu0 %vm181_vm11, %v174_v30  ;;  %v176_v7 = vsel %vm172_vm7, %v169_v28, %v171_v17  ;;  %v175_v10 = vsel %vm172_vm7, %v167_v27, %v169_v28  ;;  %v2944_v27 = vcombine.high %v747_v23, %v747_v23 }
 0x10a   :  { %2911 = vmatprep.subr.msk.bf16.mxu1 %vm181_vm11, %v176_v7  ;;  %195 = vmatpush1.bf16.msra.mxu0 %v183_v8  ;;  %v189_v33 = vsel %vm181_vm11, %v175_v10, 0  ;;  %v2943_v8 = vcombine.low %v747_v23, %v747_v23 }
 0x10b   :  { %236 = vmatpush1.bf16.msra.mxu1 %v189_v33  ;;  %v460_v37 = vpop.permute.xlu0 %459 }
 0x10c   :  { %v462_v38 = vpop.permute.xlu1 %461 }
 0x10d   :  { %2910 = vmatmul.mubr.msk.bf16.vlgmr.msra.gmra.mrb[0].mxu0 %vm177_vm14, %v2903_v34  ;;  %v470_v61 = vsel %vm4240_vm10, %v460_v37, %v462_v38 }
 0x10e   :  { %2912 = vmatmul.mubr.msk.bf16.vlgmr.msra.gmra.mrb[0].mxu1 %vm177_vm14, %v2903_v34  ;;  %351 = vmatprep.mubr.bf16.mxu0 %v3213_v3  ;;  %v478_v13 = vsel %vm181_vm11, %v470_v61, 0 }
 0x10f   :  { %v296_v42 = vpop.permute.xlu0 %295  ;;  %392 = vmatprep.mubr.bf16.mxu1 %v3213_v3 }
 0x110   :  { %v303_v47 = vsel %vm299_vm3, %v296_v42, %v298_v21  ;;  %v294_v48 = vpop.permute.xlu1 %293  ;;  %v2922_v21 = vld [vmem:[%s4211_s2 + $0x8] sm:$0xf] }
 0x111   :  { %v301_v49 = vsel %vm299_vm3, %v292_v25, %v294_v48  ;;  %v302_v52 = vsel %vm299_vm3, %v294_v48, %v296_v42  ;;  %2920 = vmatprep.subr.msk.bf16.mxu1 %vm181_vm11, %v303_v47  ;;  %v748_v25 = vld [vmem:[#allocation2 + $0xc] sm:$0x33]  ;;  %v765_v48 = vsel %vm181_vm11, %v2943_v8, 0  ;;  %v2961_v8 = vld [vmem:[%s4211_s2 + $0x18] sm:$0xf] }
 0x112   :  { %v314_v56 = vsel %vm181_vm11, %v302_v52, 0  ;;  %2918 = vmatprep.subr.msk.bf16.mxu0 %vm181_vm11, %v301_v49  ;;  %v2946_v7 = vcombine.high %v748_v25, %v748_v25  ;;  %v2945_v10 = vcombine.low %v748_v25, %v748_v25  ;;  %v2932_v42 = vld [vmem:[%s4211_s2 + $0xc] sm:$0xf] }
 0x113   :  { %320 = vmatpush1.bf16.msra.mxu0 %v308_v53  ;;  %361 = vmatpush1.bf16.msra.mxu1 %v314_v56  ;;  %v468_v57 = vpop.permute.xlu0 %467 }
 0x114   :  { %v632_v41 = vpop.permute.xlu1 %631  ;;  %v771_v49 = vsel %vm181_vm11, %v2945_v10, 0 }
 0x116   :  { %2919 = vmatmul.mubr.msk.bf16.vlgmr.msra.gmra.mrb[4].mxu0 %vm177_vm14, %v105_v59  ;;  %2921 = vmatmul.mubr.msk.bf16.vlgmr.msra.gmra.mrb[4].mxu1 %vm177_vm14, %v105_v59 }
 0x117   :  { %v464_v62 = vpop.permute.xlu0 %463  ;;  %521 = vmatprep.mubr.bf16.mxu0 %v3213_v3  ;;  %562 = vmatprep.mubr.bf16.mxu1 %v3213_v3 }
 0x118   :  { %v471_v5 = vsel %vm4240_vm10, %v462_v38, %v464_v62  ;;  %v466_v6 = vpop.permute.xlu1 %465 }
 0x119   :  { %v472_v0 = vsel %vm4240_vm10, %v464_v62, %v466_v6  ;;  %v473_v2 = vsel %vm4240_vm10, %v466_v6, %v468_v57  ;;  %2928 = vmatprep.subr.msk.bf16.mxu0 %vm181_vm11, %v471_v5  ;;  %v2942_v57 = vld [vmem:[%s4211_s2 + $0x10] sm:$0xf] }
 0x11a   :  { %v484_v16 = vsel %vm181_vm11, %v472_v0, 0  ;;  %2930 = vmatprep.subr.msk.bf16.mxu1 %vm181_vm11, %v473_v2  ;;  %490 = vmatpush1.bf16.msra.mxu0 %v478_v13 }
 0x11b   :  { %531 = vmatpush1.bf16.msra.mxu1 %v484_v16  ;;  %v634_v17 = vpop.permute.xlu0 %633 }
 0x11c   :  { %v640_v22 = vpop.permute.xlu1 %639  ;;  %v642_v26 = vsel %vm4239_vm9, %v632_v41, %v634_v17 }
 0x11d   :  { %v650_v37 = vsel %vm181_vm11, %v642_v26, 0 }
 0x11e   :  { %2929 = vmatmul.mubr.msk.bf16.vlgmr.msra.gmra.mrb[8].mxu0 %vm177_vm14, %v2922_v21  ;;  %2931 = vmatmul.mubr.msk.bf16.vlgmr.msra.gmra.mrb[8].mxu1 %vm177_vm14, %v2922_v21 }
 0x11f   :  { %v638_v55 = vpop.permute.xlu0 %637  ;;  %693 = vmatprep.mubr.bf16.mxu0 %v3213_v3  ;;  %734 = vmatprep.mubr.bf16.mxu1 %v3213_v3 }
 0x120   :  { %v645_v28 = vsel %vm4239_vm9, %v638_v55, %v640_v22  ;;  %v636_v30 = vpop.permute.xlu1 %635 }
 0x121   :  { %v643_v33 = vsel %vm4239_vm9, %v634_v17, %v636_v30  ;;  %v644_v34 = vsel %vm4239_vm9, %v636_v30, %v638_v55  ;;  %2940 = vmatprep.subr.msk.bf16.mxu1 %vm181_vm11, %v645_v28  ;;  %v2951_v17 = vld [vmem:[%s4211_s2 + $0x14] sm:$0xf] }
 0x122   :  { %v656_v38 = vsel %vm181_vm11, %v644_v34, 0  ;;  %2938 = vmatprep.subr.msk.bf16.mxu0 %vm181_vm11, %v643_v33 }
 0x123   :  { %662 = vmatpush1.bf16.msra.mxu0 %v650_v37  ;;  %703 = vmatpush1.bf16.msra.mxu1 %v656_v38  ;;  %v921_v39 = vpop.permute.xlu0 %920 }
 0x124   :  { %v923_v47 = vpop.permute.xlu1 %922  ;;  %2947 = vmatprep.subr.msk.bf16.mxu0 %vm181_vm11, %v2944_v27  ;;  %2949 = vmatprep.subr.msk.bf16.mxu1 %vm181_vm11, %v2946_v7 }
 0x125   :  { %v930_v41 = vsel %vm4237_vm6, %v921_v39, %v923_v47 }
 0x126   :  { %2939 = vmatmul.mubr.msk.bf16.vlgmr.msra.gmra.mrb[12].mxu0 %vm177_vm14, %v2932_v42  ;;  %2941 = vmatmul.mubr.msk.bf16.vlgmr.msra.gmra.mrb[12].mxu1 %vm177_vm14, %v2932_v42  ;;  %v938_v6 = vsel %vm181_vm11, %v930_v41, 0 }
 0x127   :  { %v929_v52 = vpop.permute.xlu0 %928  ;;  %777 = vmatpush1.bf16.msra.mxu0 %v765_v48  ;;  %818 = vmatpush1.bf16.msra.mxu1 %v771_v49 }
 0x128   :  { %v1093_v53 = vpop.permute.xlu1 %1092  ;;  %808 = vmatprep.mubr.bf16.mxu0 %v3213_v3  ;;  %849 = vmatprep.mubr.bf16.mxu1 %v3213_v3 }
 0x12b   :  { %v1095_v56 = vpop.permute.xlu0 %1094 }
 0x12c   :  { %v1101_v59 = vpop.permute.xlu1 %1100  ;;  %v1102_v22 = vsel %vm4238_vm4, %v1093_v53, %v1095_v56 }
 0x12d   :  { %v1110_v28 = vsel %vm181_vm11, %v1102_v22, 0 }
 0x12e   :  { %2948 = vmatmul.mubr.msk.bf16.vlgmr.msra.gmra.mrb[16].mxu0 %vm177_vm14, %v2942_v57  ;;  %2950 = vmatmul.mubr.msk.bf16.vlgmr.msra.gmra.mrb[16].mxu1 %vm177_vm14, %v2942_v57 }
 0x12f   :  { %v925_v61 = vpop.permute.xlu0 %924  ;;  %981 = vmatprep.mubr.bf16.mxu0 %v3213_v3  ;;  %1022 = vmatprep.mubr.bf16.mxu1 %v3213_v3 }
 0x130   :  { %v931_v62 = vsel %vm4237_vm6, %v923_v47, %v925_v61  ;;  %v927_v5 = vpop.permute.xlu1 %926 }
 0x131   :  { %v932_v13 = vsel %vm4237_vm6, %v925_v61, %v927_v5  ;;  %v933_v0 = vsel %vm4237_vm6, %v927_v5, %v929_v52  ;;  %2957 = vmatprep.subr.msk.bf16.mxu0 %vm181_vm11, %v931_v62  ;;  %vm4309_vm6 = vcmask 916480   ;;  %v2971_v52 = vld [vmem:[%s4211_s2 + $0x1c] sm:$0xf] }
 0x132   :  { %v944_v2 = vsel %vm181_vm11, %v932_v13, 0  ;;  %2959 = vmatprep.subr.msk.bf16.mxu1 %vm181_vm11, %v933_v0  ;;  %950 = vmatpush1.bf16.msra.mxu0 %v938_v6  ;;  %v2981_v13 = vld [vmem:[%s4211_s2 + $0x20] sm:$0xf] }
 0x133   :  { %991 = vmatpush1.bf16.msra.mxu1 %v944_v2  ;;  %v1263_v16 = vpop.permute.xlu0 %1262 }
 0x134   :  { %v1265_v21 = vpop.permute.xlu1 %1264 }
 0x135   :  { %v1272_v33 = vsel %vm4309_vm6, %v1263_v16, %v1265_v21 }
 0x136   :  { %2958 = vmatmul.mubr.msk.bf16.vlgmr.msra.gmra.mrb[20].mxu0 %vm177_vm14, %v2951_v17  ;;  %2960 = vmatmul.mubr.msk.bf16.vlgmr.msra.gmra.mrb[20].mxu1 %vm177_vm14, %v2951_v17  ;;  %v1280_v39 = vsel %vm181_vm11, %v1272_v33, 0 }
 0x137   :  { %v1099_v23 = vpop.permute.xlu0 %1098  ;;  %1153 = vmatprep.mubr.bf16.mxu0 %v3213_v3  ;;  %1194 = vmatprep.mubr.bf16.mxu1 %v3213_v3 }
 0x138   :  { %v1105_v25 = vsel %vm4238_vm4, %v1099_v23, %v1101_v59  ;;  %v1097_v26 = vpop.permute.xlu1 %1096 }
 0x139   :  { %v1103_v55 = vsel %vm4238_vm4, %v1095_v56, %v1097_v26  ;;  %v1104_v27 = vsel %vm4238_vm4, %v1097_v26, %v1099_v23  ;;  %2969 = vmatprep.subr.msk.bf16.mxu1 %vm181_vm11, %v1105_v25  ;;  %vm4310_vm4 = vmmov %vm4309_vm6 }
 0x13a   :  { %v1116_v30 = vsel %vm181_vm11, %v1104_v27, 0  ;;  %2967 = vmatprep.subr.msk.bf16.mxu0 %vm181_vm11, %v1103_v55  ;;  %vm4311_vm9 = vmmov %vm4310_vm4 }
 0x13b   :  { %1122 = vmatpush1.bf16.msra.mxu0 %v1110_v28  ;;  %1163 = vmatpush1.bf16.msra.mxu1 %v1116_v30  ;;  %v1271_v7 = vpop.permute.xlu0 %1270  ;;  %vm4312_vm10 = vmmov %vm4310_vm4 }
 0x13c   :  { %v1434_v10 = vpop.permute.xlu1 %1433 }
 0x13e   :  { %2968 = vmatmul.mubr.msk.bf16.vlgmr.msra.gmra.mrb[24].mxu0 %vm177_vm14, %v2961_v8  ;;  %2970 = vmatmul.mubr.msk.bf16.vlgmr.msra.gmra.mrb[24].mxu1 %vm177_vm14, %v2961_v8 }
 0x13f   :  { %v1267_v34 = vpop.permute.xlu0 %1266  ;;  %1323 = vmatprep.mubr.bf16.mxu0 %v3213_v3  ;;  %1364 = vmatprep.mubr.bf16.mxu1 %v3213_v3 }
 0x140   :  { %v1273_v37 = vsel %vm4310_vm4, %v1265_v21, %v1267_v34  ;;  %v1269_v38 = vpop.permute.xlu1 %1268  ;;  %vm4313_vm4 = vcmask 908288  }
 0x141   :  { %v1274_v42 = vsel %vm4311_vm9, %v1267_v34, %v1269_v38  ;;  %v1275_v47 = vsel %vm4312_vm10, %v1269_v38, %v1271_v7  ;;  %2977 = vmatprep.subr.msk.bf16.mxu0 %vm181_vm11, %v1273_v37  ;;  %vm4314_vm6 = vmmov %vm4313_vm4 }
 0x142   :  { %v1286_v48 = vsel %vm181_vm11, %v1274_v42, 0  ;;  %2979 = vmatprep.subr.msk.bf16.mxu1 %vm181_vm11, %v1275_v47  ;;  %1292 = vmatpush1.bf16.msra.mxu0 %v1280_v39  ;;  %vm4315_vm10 = vmmov %vm4313_vm4 }
 0x143   :  { %1333 = vmatpush1.bf16.msra.mxu1 %v1286_v48  ;;  %v1436_v49 = vpop.permute.xlu0 %1435  ;;  %vm4316_vm9 = vmmov %vm4313_vm4 }
 0x144   :  { %v1443_v53 = vsel %vm4313_vm4, %v1434_v10, %v1436_v49  ;;  %v1438_v56 = vpop.permute.xlu1 %1437  ;;  %vm4317_vm4 = vcmp.ne.s16.totalorder %v3577_v36, 0 }
 0x145   :  { %v1451_v57 = vsel %vm181_vm11, %v1443_v53, 0  ;;  %v1444_v59 = vsel %vm4314_vm6, %v1436_v49, %v1438_v56  ;;  %vm4318_vm6 = vcmp.ne.s16.totalorder %v3605_v54, 0 }
 0x146   :  { %2978 = vmatmul.mubr.msk.bf16.vlgmr.msra.gmra.mrb[28].mxu0 %vm177_vm14, %v2971_v52  ;;  %2980 = vmatmul.mubr.msk.bf16.vlgmr.msra.gmra.mrb[28].mxu1 %vm177_vm14, %v2971_v52 }
 0x147   :  { %2987 = vmatprep.subr.msk.bf16.mxu0 %vm181_vm11, %v1444_v59  ;;  %v1440_v41 = vpop.permute.xlu0 %1439  ;;  %1494 = vmatprep.mubr.bf16.mxu0 %v3213_v3 }
 0x148   :  { %1463 = vmatpush1.bf16.msra.mxu0 %v1451_v57  ;;  %v1445_v61 = vsel %vm4315_vm10, %v1438_v56, %v1440_v41  ;;  %v1442_v62 = vpop.permute.xlu1 %1441  ;;  %1535 = vmatprep.mubr.bf16.mxu1 %v3213_v3  ;;  %vm4319_vm10 = vcmp.ne.s16.totalorder %v3587_v45, 0 }
 0x149   :  { %v1457_v5 = vsel %vm181_vm11, %v1445_v61, 0  ;;  %v1446_v6 = vsel %vm4316_vm9, %v1440_v41, %v1442_v62  ;;  %vm4320_vm9 = vcmp.ne.s16.totalorder %v3625_v9, 0 }
 0x14a   :  { %2989 = vmatprep.subr.msk.bf16.mxu1 %vm181_vm11, %v1446_v6 }
 0x14b   :  { %1504 = vmatpush1.bf16.msra.mxu1 %v1457_v5 }
 0x14e   :  { %2988 = vmatmul.mubr.msk.bf16.vlgmr.msra.gmra.mrb[32].mxu0 %vm177_vm14, %v2981_v13  ;;  %2990 = vmatmul.mubr.msk.bf16.vlgmr.msra.gmra.mrb[32].mxu1 %vm177_vm14, %v2981_v13 }
 0x14f   :  { %1668 = vmatprep.mubr.bf16.mxu0 %v3213_v3  ;;  %1709 = vmatprep.mubr.bf16.mxu1 %v3213_v3 }
 0x1e0   :  { %v228_v0 = vpop.f32.mrb[0].mxu0 }
 0x1e1   :  { %v230_v2 = vpop.f32.mrb[1].mxu0  ;;  %v269_v16 = vpop.f32.mrb[0].mxu1 }
 0x1e2   :  { %v232_v17 = vpop.f32.mrb[2].mxu0  ;;  %v271_v21 = vpop.f32.mrb[1].mxu1 }
 0x1e3   :  { %v233_v22 = vpop.f32.mrb[3].mxu0  ;;  %v273_v23 = vpop.f32.mrb[2].mxu1 }
 0x1e4   :  { %v274_v25 = vpop.f32.mrb[3].mxu1 }
 0x1e9   :  { %v353_v26 = vpop.f32.mrb[4].mxu0  ;;  %v394_v55 = vpop.f32.mrb[4].mxu1 }
 0x1ea   :  { %v354_v27 = vadd.f32 %v353_v26, %v228_v0  ;;  %v395_v28 = vadd.f32 %v394_v55, %v269_v16  ;;  %v355_v30 = vpop.f32.mrb[5].mxu0  ;;  %v396_v7 = vpop.f32.mrb[5].mxu1 }
 0x1eb   :  { %v356_v8 = vadd.f32 %v355_v30, %v230_v2  ;;  %v397_v10 = vadd.f32 %v396_v7, %v271_v21  ;;  %v357_v33 = vpop.f32.mrb[6].mxu0  ;;  %v398_v34 = vpop.f32.mrb[6].mxu1 }
 0x1ec   :  { %v358_v37 = vpop.f32.mrb[7].mxu0  ;;  %v399_v38 = vpop.f32.mrb[7].mxu1 }
 0x1f1   :  { %v523_v39 = vpop.f32.mrb[8].mxu0  ;;  %v564_v42 = vpop.f32.mrb[8].mxu1 }
 0x1f2   :  { %v571_v47 = vadd.f32 %v523_v39, %v354_v27  ;;  %v573_v48 = vadd.f32 %v564_v42, %v395_v28  ;;  %v525_v49 = vpop.f32.mrb[9].mxu0  ;;  %v566_v52 = vpop.f32.mrb[9].mxu1 }
 0x1f3   :  { %v572_v53 = vadd.f32 %v525_v49, %v356_v8  ;;  %v574_v56 = vadd.f32 %v566_v52, %v397_v10  ;;  %v527_v57 = vpop.f32.mrb[10].mxu0  ;;  %v568_v59 = vpop.f32.mrb[10].mxu1 }
 0x1f4   :  { %v528_v41 = vpop.f32.mrb[11].mxu0  ;;  %v569_v61 = vpop.f32.mrb[11].mxu1 }
 0x1f9   :  { %v695_v62 = vpop.f32.mrb[12].mxu0  ;;  %v736_v5 = vpop.f32.mrb[12].mxu1 }
 0x1fa   :  { %v743_v6 = vadd.f32 %v695_v62, %v571_v47  ;;  %v745_v13 = vadd.f32 %v736_v5, %v573_v48  ;;  %v697_v0 = vpop.f32.mrb[13].mxu0  ;;  %v738_v2 = vpop.f32.mrb[13].mxu1 }
 0x1fb   :  { %v744_v16 = vadd.f32 %v697_v0, %v572_v53  ;;  %v746_v17 = vadd.f32 %v738_v2, %v574_v56  ;;  %v699_v21 = vpop.f32.mrb[14].mxu0  ;;  %v740_v22 = vpop.f32.mrb[14].mxu1 }
 0x1fc   :  { %v700_v23 = vpop.f32.mrb[15].mxu0  ;;  %v741_v25 = vpop.f32.mrb[15].mxu1 }
 0x201   :  { %v810_v26 = vpop.f32.mrb[16].mxu0  ;;  %v851_v55 = vpop.f32.mrb[16].mxu1 }
 0x202   :  { %v858_v27 = vadd.f32 %v810_v26, %v743_v6  ;;  %v860_v28 = vadd.f32 %v851_v55, %v745_v13  ;;  %v812_v30 = vpop.f32.mrb[17].mxu0  ;;  %v853_v7 = vpop.f32.mrb[17].mxu1 }
 0x203   :  { %v859_v8 = vadd.f32 %v812_v30, %v744_v16  ;;  %v861_v10 = vadd.f32 %v853_v7, %v746_v17  ;;  %v814_v33 = vpop.f32.mrb[18].mxu0  ;;  %v855_v34 = vpop.f32.mrb[18].mxu1 }
 0x204   :  { %v815_v37 = vpop.f32.mrb[19].mxu0  ;;  %v856_v38 = vpop.f32.mrb[19].mxu1 }
 0x209   :  { %v983_v39 = vpop.f32.mrb[20].mxu0  ;;  %v1024_v42 = vpop.f32.mrb[20].mxu1 }
 0x20a   :  { %v1031_v47 = vadd.f32 %v983_v39, %v858_v27  ;;  %v1033_v48 = vadd.f32 %v1024_v42, %v860_v28  ;;  %v985_v49 = vpop.f32.mrb[21].mxu0  ;;  %v1026_v52 = vpop.f32.mrb[21].mxu1 }
 0x20b   :  { %v1032_v53 = vadd.f32 %v985_v49, %v859_v8  ;;  %v1034_v56 = vadd.f32 %v1026_v52, %v861_v10  ;;  %v987_v57 = vpop.f32.mrb[22].mxu0  ;;  %v1028_v59 = vpop.f32.mrb[22].mxu1 }
 0x20c   :  { %v988_v41 = vpop.f32.mrb[23].mxu0  ;;  %v1029_v61 = vpop.f32.mrb[23].mxu1 }
 0x20d   :  { %v1552_v39 = vpop.permute.xlu0 %1551 }
 0x211   :  { %v1155_v62 = vpop.f32.mrb[24].mxu0  ;;  %v1196_v5 = vpop.f32.mrb[24].mxu1 }
 0x212   :  { %v1203_v6 = vadd.f32 %v1155_v62, %v1031_v47  ;;  %v1205_v13 = vadd.f32 %v1196_v5, %v1033_v48  ;;  %v1157_v0 = vpop.f32.mrb[25].mxu0  ;;  %v1198_v2 = vpop.f32.mrb[25].mxu1 }
 0x213   :  { %v1204_v16 = vadd.f32 %v1157_v0, %v1032_v53  ;;  %v1206_v17 = vadd.f32 %v1198_v2, %v1034_v56  ;;  %v1159_v21 = vpop.f32.mrb[26].mxu0  ;;  %v1200_v22 = vpop.f32.mrb[26].mxu1 }
 0x214   :  { %v1160_v23 = vpop.f32.mrb[27].mxu0  ;;  %v1201_v25 = vpop.f32.mrb[27].mxu1 }
 0x219   :  { %v1325_v26 = vpop.f32.mrb[28].mxu0  ;;  %v1366_v55 = vpop.f32.mrb[28].mxu1 }
 0x21a   :  { %v1373_v27 = vadd.f32 %v1325_v26, %v1203_v6  ;;  %v1375_v28 = vadd.f32 %v1366_v55, %v1205_v13  ;;  %v1327_v30 = vpop.f32.mrb[29].mxu0  ;;  %v1368_v7 = vpop.f32.mrb[29].mxu1 }
 0x21b   :  { %v1374_v8 = vadd.f32 %v1327_v30, %v1204_v16  ;;  %v1376_v10 = vadd.f32 %v1368_v7, %v1206_v17  ;;  %v1329_v33 = vpop.f32.mrb[30].mxu0  ;;  %v1370_v34 = vpop.f32.mrb[30].mxu1 }
 0x21c   :  { %v1330_v37 = vpop.f32.mrb[31].mxu0  ;;  %v1371_v38 = vpop.f32.mrb[31].mxu1 }
 0x221   :  { %v1496_v42 = vpop.f32.mrb[32].mxu0  ;;  %v1537_v47 = vpop.f32.mrb[32].mxu1 }
 0x222   :  { %v1544_v48 = vadd.f32 %v1496_v42, %v1373_v27  ;;  %v1546_v49 = vadd.f32 %v1537_v47, %v1375_v28  ;;  %v1498_v52 = vpop.f32.mrb[33].mxu0  ;;  %v1539_v53 = vpop.f32.mrb[33].mxu1 }
 0x223   :  { %v1545_v56 = vadd.f32 %v1498_v52, %v1374_v8  ;;  %v1547_v57 = vadd.f32 %v1539_v53, %v1376_v10  ;;  %v1500_v59 = vpop.f32.mrb[34].mxu0  ;;  %v1541_v41 = vpop.f32.mrb[34].mxu1 }
 0x224   :  { %v1554_v61 = vadd.f32 %v1552_v39, %v1544_v48  ;;  %v1556_v62 = vadd.f32 %v1552_v39, %v1546_v49  ;;  %v1501_v5 = vpop.f32.mrb[35].mxu0  ;;  %v1542_v6 = vpop.f32.mrb[35].mxu1 }
 0x225   :  { %v1555_v13 = vadd.f32 %v1552_v39, %v1545_v56  ;;  %v1557_v0 = vadd.f32 %v1552_v39, %v1547_v57  ;;  %v2225_v5 = vld [vmem:[#allocation2 + $0x14] sm:$0xf] }
 0x226   :  { %v3926_v2 = vmax.f32 %v1554_v61, 0.0  ;;  %v3928_v16 = vmax.f32 %v1556_v62, 0.0 }
 0x227   :  { %v3930_v17 = vmax.f32 %v1555_v13, 0.0  ;;  %v3932_v21 = vmax.f32 %v1557_v0, 0.0  ;;  %v2228_v13 = vsel %vm3688_vm1, %v2225_v5, 0  ;;  %vm4329_vm1 = vcmp.ne.s16.totalorder %v3726_v20, 0 }
 0x228   :  { %v3046_v0 = vcombine.low %v2228_v13, %v2228_v13 }
 0x229   :  { %v3936_v22 = vpack.c.bf16 %v3930_v17, %v3926_v2  ;;  %v3940_v23 = vpack.c.bf16 %v3932_v21, %v3928_v16 }
 0x22b   :  { %1578 = vst [vmem:[#allocation2 + $0x4] sm:$0xff] %v3936_v22  ;;  %1579 = vst [vmem:[#allocation2 + $0xc] sm:$0xff] %v3940_v23 }
 0x232   :  { %v1580_v25 = vld [vmem:[#allocation2] sm:$0xff]  ;;  %v1581_v26 = vld [vmem:[#allocation2 + $0x8] sm:$0xff]  ;;  %v1582_v55 = vld [vmem:[#allocation2 + $0x10] sm:$0xf] }
 0x233   :  { %v1587_v27 = vsel %vm4317_vm4, %v1580_v25, 0  ;;  %v1588_v28 = vsel %vm4318_vm6, %v1581_v26, 0  ;;  %v1589_v8 = vsel %vm3582_vm15, %v1582_v55, 0  ;;  %v1583_v34 = vsel %vm4319_vm10, %v1580_v25, 0 }
 0x234   :  { %v2994_v30 = vcombine.low %v1587_v27, %v1587_v27  ;;  %v2996_v7 = vcombine.low %v1588_v28, %v1588_v28  ;;  %v2995_v10 = vcombine.high %v1587_v27, %v1587_v27  ;;  %v2998_v33 = vcombine.low %v1589_v8, %v1589_v8 }
 0x235   :  { %v2997_v36 = vcombine.high %v1588_v28, %v1588_v28  ;;  %v3004_v54 = vcombine.high %v1583_v34, %v1583_v34  ;;  %v1584_v37 = vsel %vm4320_vm9, %v1581_v26, 0  ;;  %v3003_v44 = vcombine.low %v1583_v34, %v1583_v34 }
 0x236   :  { %1605 = vrot.lane.b32.xlu1 %v2994_v30, %s3220_s15  ;;  %1609 = vrot.lane.b32.xlu0 %v2996_v7, %s3220_s15  ;;  %v3006_v38 = vcombine.high %v1584_v37, %v1584_v37  ;;  %vm4321_vm15 = vcmp.ne.s16.totalorder %v3616_v60, 0  ;;  %v3005_v42 = vcombine.low %v1584_v37, %v1584_v37  ;;  %vm4322_vm4 = vcmp.ne.s16.totalorder %v3646_v24, 0 }
 0x237   :  { %v1842_v39 = vsel %vm4321_vm15, %v1580_v25, 0  ;;  %v1843_v47 = vsel %vm4322_vm4, %v1581_v26, 0  ;;  %v1585_v9 = vsel %vm3589_vm0, %v1582_v55, 0  ;;  %v1844_v60 = vsel %vm3634_vm8, %v1582_v55, 0 }
 0x238   :  { %v3013_v45 = vcombine.low %v1842_v39, %v1842_v39  ;;  %v3015_v48 = vcombine.low %v1843_v47, %v1843_v47  ;;  %v3007_v49 = vcombine.low %v1585_v9, %v1585_v9  ;;  %v3017_v52 = vcombine.low %v1844_v60, %v1844_v60 }
 0x239   :  { %v3014_v53 = vcombine.high %v1842_v39, %v1842_v39  ;;  %vm4323_vm6 = vcmp.ne.s16.totalorder %v3639_v19, 0  ;;  %v3016_v56 = vcombine.high %v1843_v47, %v1843_v47  ;;  %vm4324_vm0 = vcmp.ne.s16.totalorder %v3668_v32, 0 }
 0x23a   :  { %1607 = vrot.lane.b32.xlu1 %v2995_v10, %s3220_s15  ;;  %1613 = vrot.lane.b32.xlu0 %v2998_v33, %s3220_s15  ;;  %v1975_v24 = vsel %vm4323_vm6, %v1580_v25, 0  ;;  %v1976_v57 = vsel %vm4324_vm0, %v1581_v26, 0  ;;  %vm4325_vm8 = vcmp.ne.s16.totalorder %v3678_v40, 0  ;;  %vm4326_vm10 = vcmp.ne.s16.totalorder %v3716_v14, 0 }
 0x23b   :  { %v3024_v46 = vcombine.high %v1975_v24, %v1975_v24  ;;  %v3026_v18 = vcombine.high %v1976_v57, %v1976_v57  ;;  %v3023_v59 = vcombine.low %v1975_v24, %v1975_v24  ;;  %v2226_v19 = vsel %vm4325_vm8, %v3936_v22, 0 }
 0x23c   :  { %v3042_v41 = vcombine.low %v2226_v19, %v2226_v19  ;;  %v3025_v61 = vcombine.low %v1976_v57, %v1976_v57  ;;  %v2227_v32 = vsel %vm4326_vm10, %v3940_v23, 0  ;;  %v1977_v62 = vsel %vm3662_vm12, %v1582_v55, 0 }
 0x23d   :  { %v3044_v40 = vcombine.low %v2227_v32, %v2227_v32  ;;  %v3027_v6 = vcombine.low %v1977_v62, %v1977_v62  ;;  %v3043_v14 = vcombine.high %v2226_v19, %v2226_v19  ;;  %vm4327_vm9 = vcmp.ne.s16.totalorder %v3693_v51, 0 }
 0x23e   :  { %1611 = vrot.lane.b32.xlu1 %v2997_v36, %s3220_s15  ;;  %1733 = vrot.lane.b32.xlu0 %v3004_v54, %s3221_s16  ;;  %v2359_v12 = vsel %vm4327_vm9, %v3936_v22, 0  ;;  %v3045_v26 = vcombine.high %v2227_v32, %v2227_v32  ;;  %vm4328_vm12 = vcmp.ne.s16.totalorder %v3734_v29, 0  ;;  %v2492_v51 = vsel %vm4329_vm1, %v3936_v22, 0  ;;  %v1586_v32 = vld [vmem:[%s4213_s4] sm:$0xf] }
 0x23f   :  { %v3053_v25 = vcombine.high %v2359_v12, %v2359_v12  ;;  %v2360_v50 = vsel %vm4328_vm12, %v3940_v23, 0  ;;  %v3052_v27 = vcombine.low %v2359_v12, %v2359_v12  ;;  %v3062_v28 = vcombine.low %v2492_v51, %v2492_v51 }
 0x240   :  { %v3055_v55 = vcombine.high %v2360_v50, %v2360_v50  ;;  %v3054_v30 = vcombine.low %v2360_v50, %v2360_v50  ;;  %vm4330_vm15 = vcmp.ne.s16.totalorder %v3756_v43, 0  ;;  %v2361_v7 = vsel %vm3707_vm5, %v2225_v5, 0 }
 0x241   :  { %v2493_v29 = vsel %vm4330_vm15, %v3940_v23, 0  ;;  %v3056_v20 = vcombine.low %v2361_v7, %v2361_v7  ;;  %v2494_v10 = vsel %vm3747_vm2, %v2225_v5, 0  ;;  %v3063_v34 = vcombine.high %v2492_v51, %v2492_v51 }
 0x242   :  { %1731 = vrot.lane.b32.xlu1 %v3003_v44, %s3221_s16  ;;  %1737 = vrot.lane.b32.xlu0 %v3006_v38, %s3221_s16  ;;  %v3064_v8 = vcombine.low %v2493_v29, %v2493_v29  ;;  %v3066_v33 = vcombine.low %v2494_v10, %v2494_v10  ;;  %vm4331_vm4 = vcmp.ne.s16.totalorder %v3743_v31, 0  ;;  %v3065_v36 = vcombine.high %v2493_v29, %v2493_v29  ;;  %v2758_v31 = vld [vmem:[%s4214_s5] sm:$0xff] }
 0x243   :  { %v2625_v1 = vsel %vm4331_vm4, %v3936_v22, 0  ;;  %vm4332_vm5 = vcmp.ne.s16.totalorder %v3770_v58, 0  ;;  %v2627_v44 = vsel %vm3780_vm13, %v2225_v5, 0  ;;  %vm4333_vm2 = vcmask 1043456  }
 0x244   :  { %v3073_v43 = vcombine.high %v2625_v1, %v2625_v1  ;;  %v2626_v35 = vsel %vm4332_vm5, %v3940_v23, 0  ;;  %v3072_v37 = vcombine.low %v2625_v1, %v2625_v1  ;;  %v3076_v58 = vcombine.low %v2627_v44, %v2627_v44  ;;  %v2769_v23 = vld [vmem:[%s4216_s7] sm:$0xff]  ;;  %vm4334_vm13 = vmmov %vm4333_vm2 }
 0x245   :  { %v3075_v54 = vcombine.high %v2626_v35, %v2626_v35  ;;  %v3074_v22 = vcombine.low %v2626_v35, %v2626_v35  ;;  %vm1619_vm6 = vcmask 64512   ;;  %vm4335_vm0 = vmmov %vm4333_vm2  ;;  %vm4341_vm1 = vcmask 121856  }
 0x246   :  { %1860 = vrot.lane.b32.xlu0 %v3013_v45, %s3219_s14  ;;  %1735 = vrot.lane.b32.xlu1 %v3005_v42, %s3221_s16  ;;  %vm4336_vm8 = vmmov %vm4335_vm0 }
 0x247   :  { %vm4338_vm10 = vmmov %vm4335_vm0 }
 0x248   :  { %vm4339_vm9 = vmmov %vm4335_vm0 }
 0x249   :  { %vm4340_vm12 = vmmov %vm4335_vm0 }
 0x24a   :  { %1864 = vrot.lane.b32.xlu0 %v3015_v48, %s3219_s14  ;;  %1739 = vrot.lane.b32.xlu1 %v3007_v49, %s3221_s16  ;;  %v2993_v48 = vld [vmem:[%s4213_s4 + $0x4] sm:$0xf]  ;;  %vm4342_vm15 = vmmov %vm4341_vm1 }
 0x24b   :  { %vm4343_vm4 = vmmov %vm4335_vm0 }
 0x24c   :  { %vm4345_vm5 = vmmov %vm4341_vm1 }
 0x24e   :  { %1868 = vrot.lane.b32.xlu0 %v3017_v52, %s3219_s14  ;;  %1862 = vrot.lane.b32.xlu1 %v3014_v53, %s3219_s14 }
 0x252   :  { %1995 = vrot.lane.b32.xlu0 %v3024_v46, %s3218_s13  ;;  %1866 = vrot.lane.b32.xlu1 %v3016_v56, %s3219_s14 }
 0x256   :  { %1999 = vrot.lane.b32.xlu0 %v3026_v18, %s3218_s13  ;;  %1993 = vrot.lane.b32.xlu1 %v3023_v59, %s3218_s13 }
 0x25a   :  { %2244 = vrot.lane.b32.xlu0 %v3042_v41, %s3217_s12  ;;  %1997 = vrot.lane.b32.xlu1 %v3025_v61, %s3218_s13 }
 0x25e   :  { %2248 = vrot.lane.b32.xlu0 %v3044_v40, %s3217_s12  ;;  %2001 = vrot.lane.b32.xlu1 %v3027_v6, %s3218_s13 }
 0x262   :  { %2252 = vrot.lane.b32.xlu0 %v3046_v0, %s3217_s12  ;;  %2246 = vrot.lane.b32.xlu1 %v3043_v14, %s3217_s12 }
 0x266   :  { %2379 = vrot.lane.b32.xlu0 %v3053_v25, %s3216_s11  ;;  %2250 = vrot.lane.b32.xlu1 %v3045_v26, %s3217_s12 }
 0x26a   :  { %2383 = vrot.lane.b32.xlu0 %v3055_v55, %s3216_s11  ;;  %2377 = vrot.lane.b32.xlu1 %v3052_v27, %s3216_s11 }
 0x26e   :  { %2510 = vrot.lane.b32.xlu0 %v3062_v28, %s3214_s0  ;;  %2381 = vrot.lane.b32.xlu1 %v3054_v30, %s3216_s11  ;;  %v3012_v28 = vld [vmem:[%s4213_s4 + $0x8] sm:$0xf] }
 0x272   :  { %2514 = vrot.lane.b32.xlu0 %v3064_v8, %s3214_s0  ;;  %2385 = vrot.lane.b32.xlu1 %v3056_v20, %s3216_s11 }
 0x276   :  { %2518 = vrot.lane.b32.xlu0 %v3066_v33, %s3214_s0  ;;  %2512 = vrot.lane.b32.xlu1 %v3063_v34, %s3214_s0  ;;  %v3185_v34 = vpack.c.bf16 %v3930_v17, %v3930_v17  ;;  %v3187_v17 = vpack.c.bf16 %v3926_v2, %v3926_v2 }
 0x27a   :  { %2645 = vrot.lane.b32.xlu0 %v3073_v43, %s3215_s10  ;;  %2516 = vrot.lane.b32.xlu1 %v3065_v36, %s3214_s0 }
 0x27e   :  { %2649 = vrot.lane.b32.xlu0 %v3075_v54, %s3215_s10  ;;  %2643 = vrot.lane.b32.xlu1 %v3072_v37, %s3215_s10  ;;  %v3186_v37 = vpack.c.bf16 %v3932_v21, %v3932_v21  ;;  %v3188_v21 = vpack.c.bf16 %v3928_v16, %v3928_v16 }
 0x282   :  { %2761 = vperm.xlu0 %3178, %v2758_v31   ;;  %2647 = vrot.lane.b32.xlu1 %v3074_v22, %s3215_s10  ;;  %v3022_v31 = vld [vmem:[%s4213_s4 + $0xc] sm:$0xf] }
 0x286   :  { %2651 = vrot.lane.b32.xlu1 %v3076_v58, %s3215_s10 }
 0x28a   :  { %2772 = vperm.xlu1 %3179, %v2769_v23  }
 0x2a8   :  { %v1610_v38 = vpop.permute.xlu0 %1609  ;;  %v1606_v39 = vpop.permute.xlu1 %1605 }
 0x2ac   :  { %v1614_v45 = vpop.permute.xlu0 %1613  ;;  %v1608_v42 = vpop.permute.xlu1 %1607 }
 0x2ad   :  { %v1615_v47 = vsel %vm172_vm7, %v1606_v39, %v1608_v42  ;;  %v1616_v63 = vsel %vm172_vm7, %v1608_v42, %v1610_v38 }
 0x2ae   :  { %v1625_v9 = vsel %vm4333_vm2, %v1615_v47, 0  ;;  %2999 = vmatprep.subr.msk.bf16.mxu0 %vm4334_vm13, %v1616_v63  ;;  %vm4346_vm2 = vmmov %vm4341_vm1  ;;  %v3032_v47 = vld [vmem:[%s4213_s4 + $0x10] sm:$0xf] }
 0x2af   :  { %1637 = vmatpush1.bf16.msra.mxu0 %v1625_v9  ;;  %vm4347_vm13 = vmmov %vm4335_vm0 }
 0x2b0   :  { %v1734_v49 = vpop.permute.xlu0 %1733  ;;  %v1612_v60 = vpop.permute.xlu1 %1611 }
 0x2b1   :  { %v1617_v52 = vsel %vm172_vm7, %v1610_v38, %v1612_v60  ;;  %v1618_v53 = vsel %vm172_vm7, %v1612_v60, %v1614_v45  ;;  %vm4337_vm7 = vmmov %vm4335_vm0 }
 0x2b2   :  { %v1631_v24 = vsel %vm4335_vm0, %v1617_v52, 0  ;;  %3000 = vmatmul.mubr.msk.bf16.vlgmr.msra.gmra.mrb[36].mxu0 %vm1619_vm6, %v2993_v48  ;;  %3001 = vmatprep.subr.msk.bf16.mxu1 %vm4336_vm8, %v1618_v53  ;;  %vm4348_vm8 = vcmask 7168  }
 0x2b3   :  { %1678 = vmatpush1.bf16.msra.mxu1 %v1631_v24  ;;  %1792 = vmatprep.mubr.bf16.mxu0 %v3213_v3 }
 0x2b4   :  { %v1738_v46 = vpop.permute.xlu0 %1737  ;;  %v1732_v56 = vpop.permute.xlu1 %1731 }
 0x2b5   :  { %v1741_v57 = vsel %vm299_vm3, %v1732_v56, %v1734_v49 }
 0x2b6   :  { %3002 = vmatmul.mubr.msk.bf16.vlgmr.msra.gmra.mrb[36].mxu1 %vm1619_vm6, %v2993_v48  ;;  %v1749_v41 = vsel %vm4337_vm7, %v1741_v57, 0  ;;  %vm4349_vm7 = vmmov %vm4348_vm8 }
 0x2b7   :  { %1833 = vmatprep.mubr.bf16.mxu1 %v3213_v3 }
 0x2b8   :  { %v1861_v18 = vpop.permute.xlu0 %1860  ;;  %v1736_v59 = vpop.permute.xlu1 %1735 }
 0x2b9   :  { %v1742_v19 = vsel %vm299_vm3, %v1734_v49, %v1736_v59  ;;  %v1743_v61 = vsel %vm299_vm3, %v1736_v59, %v1738_v46 }
 0x2ba   :  { %3008 = vmatprep.subr.msk.bf16.mxu0 %vm4338_vm10, %v1742_v19  ;;  %v1755_v6 = vsel %vm4339_vm9, %v1743_v61, 0  ;;  %vm4350_vm10 = vmmov %vm4335_vm0 }
 0x2bb   :  { %1761 = vmatpush1.bf16.msra.mxu0 %v1749_v41  ;;  %vm4351_vm9 = vmmov %vm4335_vm0 }
 0x2bc   :  { %v1865_v62 = vpop.permute.xlu0 %1864  ;;  %v1740_v5 = vpop.permute.xlu1 %1739 }
 0x2bd   :  { %v1744_v40 = vsel %vm299_vm3, %v1738_v46, %v1740_v5  ;;  %vm4344_vm3 = vmmov %vm4335_vm0 }
 0x2be   :  { %3009 = vmatmul.mubr.msk.bf16.vlgmr.msra.gmra.mrb[36].mxu0 %vm1619_vm6, %v1586_v32  ;;  %3010 = vmatprep.subr.msk.bf16.mxu1 %vm4340_vm12, %v1744_v40  ;;  %vm4352_vm12 = vmmov %vm4349_vm7 }
 0x2bf   :  { %1802 = vmatpush1.bf16.msra.mxu1 %v1755_v6  ;;  %1921 = vmatprep.mubr.bf16.mxu0 %v3213_v3 }
 0x2c0   :  { %v1869_v13 = vpop.permute.xlu0 %1868  ;;  %v1863_v0 = vpop.permute.xlu1 %1862 }
 0x2c1   :  { %v1870_v14 = vsel %vm4341_vm1, %v1861_v18, %v1863_v0  ;;  %v1871_v12 = vsel %vm4342_vm15, %v1863_v0, %v1865_v62  ;;  %vm4353_vm1 = vmmov %vm4335_vm0  ;;  %v3041_v18 = vld [vmem:[%s4213_s4 + $0x14] sm:$0xf] }
 0x2c2   :  { %v1878_v25 = vsel %vm4343_vm4, %v1870_v14, 0  ;;  %3011 = vmatmul.mubr.msk.bf16.vlgmr.msra.gmra.mrb[36].mxu1 %vm1619_vm6, %v1586_v32  ;;  %3018 = vmatprep.subr.msk.bf16.mxu0 %vm4344_vm3, %v1871_v12  ;;  %vm4354_vm15 = vmmov %vm4349_vm7 }
 0x2c3   :  { %1890 = vmatpush1.bf16.msra.mxu0 %v1878_v25  ;;  %1962 = vmatprep.mubr.bf16.mxu1 %v3213_v3  ;;  %vm4355_vm4 = vmmov %vm4335_vm0  ;;  %v3051_v25 = vld [vmem:[%s4213_s4 + $0x18] sm:$0xf] }
 0x2c4   :  { %v1996_v26 = vpop.permute.xlu0 %1995  ;;  %v1867_v50 = vpop.permute.xlu1 %1866  ;;  %vm4356_vm3 = vmmov %vm4335_vm0 }
 0x2c5   :  { %v1872_v55 = vsel %vm4345_vm5, %v1865_v62, %v1867_v50  ;;  %v1873_v27 = vsel %vm4346_vm2, %v1867_v50, %v1869_v13  ;;  %vm4357_vm5 = vmmov %vm4335_vm0  ;;  %vm4358_vm2 = vcmask 1039360   ;;  %v3222_v13 = vmov 1983009808  }
 0x2c6   :  { %v1884_v51 = vsel %vm4347_vm13, %v1872_v55, 0  ;;  %3020 = vmatprep.subr.msk.bf16.mxu1 %vm4335_vm0, %v1873_v27  ;;  %vm4359_vm13 = vmmov %vm4335_vm0  ;;  %v40_v0 = vunpack.c.l.s4 %v3222_v13 }
 0x2c7   :  { %1931 = vmatpush1.bf16.msra.mxu1 %v1884_v51  ;;  %v2126_v23 = vsel %vm4359_vm13, %v3187_v17, 0 }
 0x2c8   :  { %v2000_v30 = vpop.permute.xlu0 %1999  ;;  %v1994_v29 = vpop.permute.xlu1 %1993  ;;  %v41_v50 = vunpack.c.0.s8 %v40_v0 }
 0x2c9   :  { %v2003_v7 = vsel %vm4348_vm8, %v1994_v29, %v1996_v26  ;;  %vm4360_vm8 = vmmov %vm4358_vm2 }
 0x2ca   :  { %3019 = vmatmul.mubr.msk.bf16.vlgmr.msra.gmra.mrb[36].mxu0 %vm1619_vm6, %v3012_v28  ;;  %v2011_v33 = vsel %vm4350_vm10, %v2003_v7, 0  ;;  %vm4362_vm10 = vmmov %vm4335_vm0 }
 0x2cb   :  { %2054 = vmatprep.mubr.bf16.mxu0 %v3213_v3 }
 0x2cc   :  { %v2245_v8 = vpop.permute.xlu0 %2244  ;;  %v1998_v20 = vpop.permute.xlu1 %1997 }
 0x2cd   :  { %v2004_v10 = vsel %vm4349_vm7, %v1996_v26, %v1998_v20  ;;  %v2005_v1 = vsel %vm4352_vm12, %v1998_v20, %v2000_v30  ;;  %vm4361_vm7 = vmmov %vm4335_vm0  ;;  %vm4364_vm12 = vcmask 924672  }
 0x2ce   :  { %3021 = vmatmul.mubr.msk.bf16.vlgmr.msra.gmra.mrb[36].mxu1 %vm1619_vm6, %v3012_v28  ;;  %3028 = vmatprep.subr.msk.bf16.mxu0 %vm4351_vm9, %v2004_v10  ;;  %v2017_v54 = vsel %vm4355_vm4, %v2005_v1, 0  ;;  %v2132_v45 = vsel %vm4361_vm7, %v3188_v21, 0  ;;  %vm4363_vm9 = vmmov %vm4358_vm2  ;;  %vm4373_vm7 = vcmask 916480  }
 0x2cf   :  { %2023 = vmatpush1.bf16.msra.mxu0 %v2011_v33  ;;  %2095 = vmatprep.mubr.bf16.mxu1 %v3213_v3  ;;  %vm4367_vm4 = vmmov %vm4335_vm0 }
 0x2d0   :  { %v2249_v43 = vpop.permute.xlu0 %2248  ;;  %3037 = vmatprep.subr.msk.bf16.mxu0 %vm4353_vm1, %v3185_v34  ;;  %v2002_v36 = vpop.permute.xlu1 %2001  ;;  %vm4365_vm1 = vmmov %vm4335_vm0 }
 0x2d1   :  { %v2006_v35 = vsel %vm4354_vm15, %v2000_v30, %v2002_v36  ;;  %vm4366_vm15 = vmmov %vm4358_vm2  ;;  %v44_v30 = vsub.s32 %v41_v50, %v3282_v4  ;;  %v3061_v4 = vld [vmem:[%s4213_s4 + $0x1c] sm:$0xf] }
 0x2d2   :  { %3030 = vmatprep.subr.msk.bf16.mxu1 %vm4356_vm3, %v2006_v35  ;;  %vm4368_vm3 = vmmov %vm4364_vm12 }
 0x2d3   :  { %2064 = vmatpush1.bf16.msra.mxu1 %v2017_v54  ;;  %vm4371_vm13 = vmmov %vm4368_vm3  ;;  %v45_v20 = vrot.slane %v3318_v11, %v44_v30  ;;  %v52_v34 = vrot.slane %v3331_v15, %v44_v30  ;;  %v3071_v15 = vld [vmem:[%s4213_s4 + $0x20] sm:$0xf]  ;;  %s3223_s4 = smov [#allocation3]  }
 0x2d4   :  { %v2253_v22 = vpop.permute.xlu0 %2252  ;;  %3039 = vmatprep.subr.msk.bf16.mxu1 %vm4357_vm5, %v3186_v37  ;;  %v2247_v44 = vpop.permute.xlu1 %2246  ;;  %vm4369_vm5 = vmmov %vm4335_vm0  ;;  %v2768_v37 = vld [vmem:[%s4215_s6] sm:$0xf]  ;;  %s2892_s6 = sshll.u32 %s3223_s4, 4  ;;  %s2893_s6 = int_to_ptr.vmem [resolvable:$true] %s2892_s6 }
 0x2d5   :  { %v2255_v58 = vsel %vm4358_vm2, %v2247_v44, %v2249_v43  ;;  %v2254_v16 = vsel %vm4363_vm9, %v2245_v8, %v2247_v44  ;;  %vm4370_vm2 = vmmov %vm4335_vm0  ;;  %v2775_v33 = vcombine.high %v45_v20, %v45_v20  ;;  %v2776_v11 = vcombine.high %v52_v34, %v52_v34  ;;  %s3189_s9 = scalar_lea.vmem %s2893_s6, 512  ;;  %p3194_p1 = scmp.lt.s32.totalorder %s2893_s6, %s2893_s6 }
 0x2d6   :  { %3029 = vmatmul.mubr.msk.bf16.vlgmr.msra.gmra.mrb[36].mxu0 %vm1619_vm6, %v3022_v31  ;;  %v2262_v49 = vsel %vm4365_vm1, %v2254_v16, 0  ;;  %vm4375_vm9 = vmmov %vm4335_vm0  ;;  %v2781_v35 = vsel %vm181_vm11, %v45_v20, 0  ;;  %v2787_v54 = vsel %vm181_vm11, %v52_v34, 0  ;;  %p3190_p0 = scmp.ne.s32.totalorder %s2893_s6, %s3189_s9  ;;  %p3195_p2 = scmp.lt.s32.totalorder %s3189_s9, %s3189_s9 }
 0x2d7   :  { %2138 = vmatpush1.bf16.msra.mxu0 %v2126_v23  ;;  %2169 = vmatprep.mubr.bf16.mxu0 %v3213_v3  ;;  %vm4377_vm1 = vmmov %vm4335_vm0 }
 0x2d8   :  { %3047 = vmatprep.subr.msk.bf16.mxu0 %vm4335_vm0, %v2255_v58  ;;  %v2251_v2 = vpop.permute.xlu1 %2250  ;;  %v2380_v39 = vpop.permute.xlu0 %2379  ;;  %p3196_p3 = por %p3195_p2, %p3194_p1 }
 0x2d9   :  { %v2257_v38 = vsel %vm4360_vm8, %v2251_v2, %v2253_v22  ;;  %v2256_v60 = vsel %vm4366_vm15, %v2249_v43, %v2251_v2  ;;  %vm4372_vm8 = vmmov %vm4368_vm3 }
 0x2da   :  { %3031 = vmatmul.mubr.msk.bf16.vlgmr.msra.gmra.mrb[36].mxu1 %vm1619_vm6, %v3022_v31  ;;  %v2268_v24 = vsel %vm4369_vm5, %v2256_v60, 0  ;;  %vm4378_vm15 = vmmov %vm4373_vm7  ;;  %vm4381_vm5 = vcmask 908288   ;;  %p3197_p4 = pnand %p3196_p3, %p3190_p0 }
 0x2db   :  { %2179 = vmatpush1.bf16.msra.mxu1 %v2132_v45  ;;  %2210 = vmatprep.mubr.bf16.mxu1 %v3213_v3 }
 0x2dc   :  { %3049 = vmatprep.subr.msk.bf16.mxu1 %vm4362_vm10, %v2257_v38  ;;  %v2378_v42 = vpop.permute.xlu1 %2377  ;;  %v2384_v63 = vpop.permute.xlu0 %2383  ;;  %vm4374_vm10 = vmmov %vm4335_vm0 }
 0x2dd   :  { %v2387_v57 = vsel %vm4371_vm13, %v2378_v42, %v2380_v39  ;;  %vm4383_vm13 = vmmov %vm4335_vm0 }
 0x2de   :  { %v2395_v41 = vsel %vm4335_vm0, %v2387_v57, 0 }
 0x2e0   :  { %v2382_v9 = vpop.permute.xlu1 %2381  ;;  %v2511_v46 = vpop.permute.xlu0 %2510 }
 0x2e1   :  { %v2388_v48 = vsel %vm4364_vm12, %v2380_v39, %v2382_v9  ;;  %v2389_v61 = vsel %vm4372_vm8, %v2382_v9, %v2384_v63  ;;  %vm4376_vm12 = vmmov %vm4373_vm7 }
 0x2e2   :  { %3038 = vmatmul.mubr.msk.bf16.vlgmr.msra.gmra.mrb[36].mxu0 %vm1619_vm6, %v3032_v47  ;;  %v2401_v5 = vsel %vm4375_vm9, %v2389_v61, 0  ;;  %vm4385_vm8 = vmmov %vm4377_vm1 }
 0x2e3   :  { %2274 = vmatpush1.bf16.msra.mxu0 %v2262_v49  ;;  %2305 = vmatprep.mubr.bf16.mxu0 %v3213_v3 }
 0x2e4   :  { %3057 = vmatprep.subr.msk.bf16.mxu0 %vm4367_vm4, %v2388_v48  ;;  %v2386_v52 = vpop.permute.xlu1 %2385  ;;  %v2515_v59 = vpop.permute.xlu0 %2514  ;;  %vm4379_vm4 = vmmov %vm4335_vm0 }
 0x2e5   :  { %v2390_v53 = vsel %vm4368_vm3, %v2384_v63, %v2386_v52  ;;  %vm4380_vm3 = vmmov %vm4373_vm7 }
 0x2e6   :  { %3040 = vmatmul.mubr.msk.bf16.vlgmr.msra.gmra.mrb[36].mxu1 %vm1619_vm6, %v3032_v47 }
 0x2e7   :  { %2315 = vmatpush1.bf16.msra.mxu1 %v2268_v24  ;;  %2346 = vmatprep.mubr.bf16.mxu1 %v3213_v3 }
 0x2e8   :  { %3059 = vmatprep.subr.msk.bf16.mxu1 %vm4370_vm2, %v2390_v53  ;;  %v2513_v56 = vpop.permute.xlu1 %2512  ;;  %v2519_v40 = vpop.permute.xlu0 %2518  ;;  %vm4382_vm2 = vmmov %vm4335_vm0 }
 0x2e9   :  { %v2521_v32 = vsel %vm4373_vm7, %v2513_v56, %v2515_v59  ;;  %v2520_v12 = vsel %vm4378_vm15, %v2511_v46, %v2513_v56  ;;  %vm4384_vm0 = vmmov %vm4381_vm5 }
 0x2ea   :  { %v2528_v55 = vsel %vm4379_vm4, %v2520_v12, 0  ;;  %vm4386_vm7 = vmmov %vm4384_vm0 }
 0x2eb   :  { %vm4388_vm9 = vmmov %vm4384_vm0 }
 0x2ec   :  { %v2517_v19 = vpop.permute.xlu1 %2516  ;;  %v2646_v26 = vpop.permute.xlu0 %2645 }
 0x2ed   :  { %v2523_v6 = vsel %vm4376_vm12, %v2517_v19, %v2519_v40  ;;  %v2522_v27 = vsel %vm4380_vm3, %v2515_v59, %v2517_v19  ;;  %vm4389_vm12 = vmmov %vm4377_vm1 }
 0x2ee   :  { %3048 = vmatmul.mubr.msk.bf16.vlgmr.msra.gmra.mrb[36].mxu0 %vm1619_vm6, %v3041_v18  ;;  %v2534_v29 = vsel %vm4383_vm13, %v2522_v27, 0 }
 0x2ef   :  { %2407 = vmatpush1.bf16.msra.mxu0 %v2395_v41  ;;  %2438 = vmatprep.mubr.bf16.mxu0 %v3213_v3 }
 0x2f0   :  { %3067 = vmatprep.subr.msk.bf16.mxu0 %vm4374_vm10, %v2521_v32  ;;  %v2644_v62 = vpop.permute.xlu1 %2643  ;;  %v2650_v7 = vpop.permute.xlu0 %2649  ;;  %vm4387_vm10 = vmmov %vm4377_vm1 }
 0x2f1   :  { %v2653_v10 = vsel %vm4386_vm7, %v2644_v62, %v2646_v26 }
 0x2f2   :  { %3050 = vmatmul.mubr.msk.bf16.vlgmr.msra.gmra.mrb[36].mxu1 %vm1619_vm6, %v3041_v18  ;;  %v2661_v1 = vsel %vm4387_vm10, %v2653_v10, 0 }
 0x2f3   :  { %2448 = vmatpush1.bf16.msra.mxu1 %v2401_v5  ;;  %2479 = vmatprep.mubr.bf16.mxu1 %v3213_v3 }
 0x2f4   :  { %3069 = vmatprep.subr.msk.bf16.mxu1 %vm4377_vm1, %v2523_v6  ;;  %v2648_v14 = vpop.permute.xlu1 %2647 }
 0x2f5   :  { %v2654_v51 = vsel %vm4381_vm5, %v2646_v26, %v2648_v14  ;;  %v2655_v43 = vsel %vm4388_vm9, %v2648_v14, %v2650_v7 }
 0x2f6   :  { %v2667_v36 = vsel %vm4389_vm12, %v2655_v43, 0 }
 0x2f8   :  { %v2652_v28 = vpop.permute.xlu1 %2651 }
 0x2f9   :  { %v2656_v8 = vsel %vm4384_vm0, %v2650_v7, %v2652_v28 }
 0x2fa   :  { %3058 = vmatmul.mubr.msk.bf16.vlgmr.msra.gmra.mrb[36].mxu0 %vm1619_vm6, %v3051_v25 }
 0x2fb   :  { %2540 = vmatpush1.bf16.msra.mxu0 %v2528_v55  ;;  %2571 = vmatprep.mubr.bf16.mxu0 %v3213_v3 }
 0x2fc   :  { %3077 = vmatprep.subr.msk.bf16.mxu0 %vm4382_vm2, %v2654_v51 }
 0x2fe   :  { %3060 = vmatmul.mubr.msk.bf16.vlgmr.msra.gmra.mrb[36].mxu1 %vm1619_vm6, %v3051_v25 }
 0x2ff   :  { %2581 = vmatpush1.bf16.msra.mxu1 %v2534_v29  ;;  %2612 = vmatprep.mubr.bf16.mxu1 %v3213_v3 }
 0x300   :  { %3079 = vmatprep.subr.msk.bf16.mxu1 %vm4385_vm8, %v2656_v8 }
 0x301   :  { %v2762_v31 = vpop.permute.xlu0 %2761 }
 0x306   :  { %3068 = vmatmul.mubr.msk.bf16.vlgmr.msra.gmra.mrb[36].mxu0 %vm1619_vm6, %v3061_v4 }
 0x307   :  { %2673 = vmatpush1.bf16.msra.mxu0 %v2661_v1  ;;  %2704 = vmatprep.mubr.bf16.mxu0 %v3213_v3 }
 0x308   :  { %3081 = vmatprep.subr.msk.bf16.mxu0 %vm181_vm11, %v2775_v33 }
 0x309   :  { %v2773_v17 = vpop.permute.xlu1 %2772 }
 0x30a   :  { %3070 = vmatmul.mubr.msk.bf16.vlgmr.msra.gmra.mrb[36].mxu1 %vm1619_vm6, %v3061_v4  ;;  %v3087_v22 = vadd.f32 %v2773_v17, %v2762_v31 }
 0x30b   :  { %2714 = vmatpush1.bf16.msra.mxu1 %v2667_v36  ;;  %2745 = vmatprep.mubr.bf16.mxu1 %v3213_v3 }
 0x30c   :  { %3083 = vmatprep.subr.msk.bf16.mxu1 %vm181_vm11, %v2776_v11 }
 0x312   :  { %3078 = vmatmul.mubr.msk.bf16.vlgmr.msra.gmra.mrb[36].mxu0 %vm1619_vm6, %v3071_v15 }
 0x313   :  { %2793 = vmatpush1.bf16.msra.mxu0 %v2781_v35  ;;  %2824 = vmatprep.mubr.bf16.mxu0 %v3213_v3 }
 0x316   :  { %3080 = vmatmul.mubr.msk.bf16.vlgmr.msra.gmra.mrb[36].mxu1 %vm1619_vm6, %v3071_v15 }
 0x317   :  { %2834 = vmatpush1.bf16.msra.mxu1 %v2787_v54  ;;  %2865 = vmatprep.mubr.bf16.mxu1 %v3213_v3 }
 0x31e   :  { %3082 = vmatmul.mubr.msk.bf16.vlgmr.msra.gmra.mrb[36].mxu0 %vm177_vm14, %v2768_v37 }
 0x322   :  { %3084 = vmatmul.mubr.msk.bf16.vlgmr.msra.gmra.mrb[36].mxu1 %vm177_vm14, %v2768_v37 }
 0x3f1   :  { %v2826_v44 = vpop.f32.mrb[36].mxu0 }
 0x3f2   :  { %v3088_v58 = vadd.f32 %v3087_v22, %v2826_v44  ;;  %v2828_v23 = vpop.f32.mrb[37].mxu0 }
 0x3f3   :  { %v3090_v21 = vadd.f32 %v3087_v22, %v2828_v23  ;;  %v2830_v2 = vpop.f32.mrb[38].mxu0 }
 0x3f4   :  { %v2878_v38 = vmax.f32 %v3088_v58, 0.0  ;;  %v2831_v39 = vpop.f32.mrb[39].mxu0 }
 0x3f5   :  { %v2879_v45 = vmax.f32 %v3090_v21, 0.0  ;;  %v2867_v3 = vpop.f32.mrb[36].mxu1 }
 0x3f6   :  { %2882 = vst [vmem:[#allocation3] sm:$0xff] %v2878_v38  ;;  %v3092_v42 = vadd.f32 %v3087_v22, %v2867_v3  ;;  %v2869_v16 = vpop.f32.mrb[37].mxu1 }
 0x3f7   :  { %2883 = vst [vmem:[#allocation3 + $0x8] sm:$0xff] %v2879_v45  ;;  %v3094_v47 = vadd.f32 %v3087_v22, %v2869_v16  ;;  %v2871_v63 = vpop.f32.mrb[38].mxu1 }
 0x3f8   :  { %v2880_v9 = vmax.f32 %v3092_v42, 0.0  ;;  %v2872_v48 = vpop.f32.mrb[39].mxu1 }
 0x3f9   :  { %v2881_v49 = vmax.f32 %v3094_v47, 0.0 }
 0x3fa   :  { %2884 = vst [vmem:[#allocation3 + $0x10] sm:$0xff] %v2880_v9 }
 0x3fb   :  { %2885 = vst [vmem:[#allocation3 + $0x18] sm:$0xff] %v2881_v49 }
 0x3fc   :  { %3200 = shalt.err (!%p3197_p4)
}
 0x3fd   :  { %s3201_s3 = scalar_lea.hbm %s4217_s8, 512 }
 0x3fe   :  { %p3202_p5 = scmp.ne.s32.totalorder %s4217_s8, %s3201_s3  ;;  %p3205_p6 = scmp.lt.u32.totalorder %s3201_s3, %s4217_s8 }
 0x400   :  { %p3207_p7 = pnand %p3205_p6, %p3202_p5 }
 0x402   :  { %3210 = shalt.err (!%p3207_p7)
}
 0x403   :  { %2895 = dma.vmem_to_hbm [thread:$0]  %s2893_s6, 512, %s4217_s8, [#allocation4]  }
 0x404   :  { %3211 = dma.done.wait [#allocation4], 512  }
 0x405   :  { %3212 = vsyncadd [#allocation4], 4294966784 }
 0x406   :  { %2899 = vsyncpa [#allocation4], 1 }

</bundles_post_ra>
